<compile_context>
chip_gen: v7x
topology: tpu7x:2x2x1
jax: 0.10.0
libtpu: 0.0.40
codegen_flags: <defaults>
</compile_context>

<pallas_src>
import jax
import jax.numpy as jnp
from jax.experimental import pallas as pl
from jax.experimental.pallas import tpu as pltpu

LATENT_DIM = 20
NUM_POINTS = 100
IN_DIM_PER_POINT = 2
OUT_DIM_PER_POINT = 1

K_RAW = LATENT_DIM + 1                    # 21
K_PAD = 24                                # pad to f32 sublane granularity (8)
H1 = 128
H2 = 256
X_OUT = NUM_POINTS * IN_DIM_PER_POINT     # 200
Y_OUT = NUM_POINTS * OUT_DIM_PER_POINT    # 100
HEAD_RAW = X_OUT + Y_OUT                  # 300
HEAD_PAD = 384                            # round up to multiple of 128 (lane-dense stores)

TILE_B = 256                              # M >= 128 keeps the MXU fed; sized for 64 MiB VMEM


def decoder_kernel(z_ref, w1_ref, b1_ref, w2_ref, b2_ref, wh_ref, bh_ref, out_ref):
    # latent_to_hidden: Linear -> ReLU -> Linear -> ReLU
    h1 = jnp.dot(z_ref[...], w1_ref[...], preferred_element_type=jnp.float32) + b1_ref[...]
    h1 = jnp.maximum(h1, 0.0)
    h2 = jnp.dot(h1, w2_ref[...], preferred_element_type=jnp.float32) + b2_ref[...]
    h2 = jnp.maximum(h2, 0.0)
    # fused heads: one lane-dense (TILE_B, 384) output
    out_ref[...] = (jnp.dot(h2, wh_ref[...], preferred_element_type=jnp.float32)
                    + bh_ref[...])


@jax.jit
def decoder_forward(z, params):
    """z: (B, latent_dim + 1) float32. Returns (x_out (B,100,2), y_out (B,100,1))."""
    B = z.shape[0]
    w1, b1, w2, b2, wx, bx, wy, by = params

    # ---- one-time layout prep (cheap XLA ops outside the kernel) ----------
    # pad K: 21 -> 24
    z_p = jnp.pad(z, ((0, 0), (0, K_PAD - K_RAW)))
    w1_p = jnp.pad(w1, ((0, K_PAD - K_RAW), (0, 0)))
    # fuse the two heads into one (256, 384) weight, zero-padded on the lane axis
    wh = jnp.pad(jnp.concatenate([wx, wy], axis=1), ((0, 0), (0, HEAD_PAD - HEAD_RAW)))
    bh = jnp.pad(jnp.concatenate([bx, by], axis=1), ((0, 0), (0, HEAD_PAD - HEAD_RAW)))
    # pad batch to a multiple of TILE_B
    n_blocks = pl.cdiv(B, TILE_B)
    B_pad = n_blocks * TILE_B
    z_p = jnp.pad(z_p, ((0, B_pad - B), (0, 0)))

    flops = 2 * B_pad * (K_PAD * H1 + H1 * H2 + H2 * HEAD_PAD)
    bytes_accessed = (
        B_pad * (K_PAD + HEAD_PAD) * 4
        + (K_PAD * H1 + H1 + H1 * H2 + H2 + H2 * HEAD_PAD + HEAD_PAD) * 4
    )

    out = pl.pallas_call(
        decoder_kernel,
        out_shape=jax.ShapeDtypeStruct((B_pad, HEAD_PAD), jnp.float32),
        grid_spec=pltpu.PrefetchScalarGridSpec(
            num_scalar_prefetch=0,
            grid=(n_blocks,),
            in_specs=[
                pl.BlockSpec((TILE_B, K_PAD), lambda i: (i, 0)),   # z tile per grid step
                pl.BlockSpec((K_PAD, H1),     lambda i: (0, 0)),   # weights/biases resident
                pl.BlockSpec((1, H1),         lambda i: (0, 0)),
                pl.BlockSpec((H1, H2),        lambda i: (0, 0)),
                pl.BlockSpec((1, H2),         lambda i: (0, 0)),
                pl.BlockSpec((H2, HEAD_PAD),  lambda i: (0, 0)),
                pl.BlockSpec((1, HEAD_PAD),   lambda i: (0, 0)),
            ],
            out_specs=pl.BlockSpec((TILE_B, HEAD_PAD), lambda i: (i, 0)),
        ),
        compiler_params=pltpu.CompilerParams(
            dimension_semantics=("parallel",),        # v7x: shard batch grid across 2 TCs
            vmem_limit_bytes=32 * 1024 * 1024,        # explicit; safe on v7x's 64 MiB VMEM
        ),
        cost_estimate=pl.CostEstimate(
            flops=flops, transcendentals=0, bytes_accessed=bytes_accessed),
    )(z_p, w1_p, b1, w2, b2, wh, bh)

    # split fused head output and drop padding; reshapes are metadata only
    x_out = out[:B, :X_OUT].reshape(B, NUM_POINTS, IN_DIM_PER_POINT)
    y_out = out[:B, X_OUT:HEAD_RAW].reshape(B, NUM_POINTS, OUT_DIM_PER_POINT)
    return x_out, y_out


def init_params(key):
    """Deterministic parameter init (shapes match the PyTorch module; weights
    stored transposed as (in, out))."""
    ks = jax.random.split(key, 8)

    def lin(kw, kb, fan_in, fan_out):
        bound = 1.0 / jnp.sqrt(fan_in)
        w = jax.random.uniform(kw, (fan_in, fan_out), jnp.float32, -bound, bound)
        b = jax.random.uniform(kb, (1, fan_out), jnp.float32, -bound, bound)
        return w, b

    w1, b1 = lin(ks[0], ks[1], K_RAW, H1)
    w2, b2 = lin(ks[2], ks[3], H1, H2)
    wx, bx = lin(ks[4], ks[5], H2, X_OUT)
    wy, by = lin(ks[6], ks[7], H2, Y_OUT)
    return (w1, b1, w2, b2, wx, bx, wy, by)


def decoder_reference(z, params):
    w1, b1, w2, b2, wx, bx, wy, by = params
    h = jnp.maximum(z @ w1 + b1, 0.0)
    h = jnp.maximum(h @ w2 + b2, 0.0)
    x = (h @ wx + bx).reshape(-1, NUM_POINTS, IN_DIM_PER_POINT)
    y = (h @ wy + by).reshape(-1, NUM_POINTS, OUT_DIM_PER_POINT)
    return x, y


if __name__ == "__main__":
    key = jax.random.PRNGKey(0)
    k_params, k_z = jax.random.split(key)
    params = init_params(k_params)

    B = 4
    z = jax.random.normal(k_z, (B, LATENT_DIM + 1), dtype=jnp.float32)

    x_out, y_out = decoder_forward(z, params)
    jax.block_until_ready((x_out, y_out))

    # sanity check against plain-JAX reference
    x_ref, y_ref = decoder_reference(z, params)
    assert x_out.shape == (B, NUM_POINTS, IN_DIM_PER_POINT)
    assert y_out.shape == (B, NUM_POINTS, OUT_DIM_PER_POINT)
    assert jnp.allclose(x_out, x_ref, atol=1e-5, rtol=1e-5)
    assert jnp.allclose(y_out, y_ref, atol=1e-5, rtol=1e-5)

    print("KERNEL_OK")
</pallas_src>

<mosaic_0001>
module attributes {stable_mosaic.version = 11 : i64} {
  func.func @decoder_kernel(%arg0: i32, %arg1: memref<256x24xf32, #tpu.memory_space<vmem>>, %arg2: memref<24x128xf32, #tpu.memory_space<vmem>>, %arg3: memref<1x128xf32, #tpu.memory_space<vmem>>, %arg4: memref<128x256xf32, #tpu.memory_space<vmem>>, %arg5: memref<1x256xf32, #tpu.memory_space<vmem>>, %arg6: memref<256x384xf32, #tpu.memory_space<vmem>>, %arg7: memref<1x384xf32, #tpu.memory_space<vmem>>, %arg8: memref<256x384xf32, #tpu.memory_space<vmem>>) attributes {dimension_semantics = [#tpu.dimension_semantics<parallel>], iteration_bounds = array<i64: 1>, scalar_prefetch = 0 : i64, scratch_operands = 0 : i64, tpu.core_type = #tpu.core_type<tc>, window_params = [{transform_indices = @transform_0, window_bounds = array<i64: 256, 24>}, {pipeline_mode = #tpu.pipeline_mode<synchronous>, transform_indices = @transform_1, window_bounds = array<i64: 24, 128>}, {pipeline_mode = #tpu.pipeline_mode<synchronous>, transform_indices = @transform_2, window_bounds = array<i64: 1, 128>}, {pipeline_mode = #tpu.pipeline_mode<synchronous>, transform_indices = @transform_3, window_bounds = array<i64: 128, 256>}, {pipeline_mode = #tpu.pipeline_mode<synchronous>, transform_indices = @transform_4, window_bounds = array<i64: 1, 256>}, {pipeline_mode = #tpu.pipeline_mode<synchronous>, transform_indices = @transform_5, window_bounds = array<i64: 256, 384>}, {pipeline_mode = #tpu.pipeline_mode<synchronous>, transform_indices = @transform_6, window_bounds = array<i64: 1, 384>}, {transform_indices = @transform_7, window_bounds = array<i64: 256, 384>}]} {
    %c0 = arith.constant 0 : index
    %c0_0 = arith.constant 0 : index
    %0 = vector.load %arg1[%c0, %c0_0] : memref<256x24xf32, #tpu.memory_space<vmem>>, vector<256x24xf32>
    %c0_1 = arith.constant 0 : index
    %c0_2 = arith.constant 0 : index
    %1 = vector.load %arg2[%c0_1, %c0_2] : memref<24x128xf32, #tpu.memory_space<vmem>>, vector<24x128xf32>
    %cst = arith.constant dense<0.000000e+00> : vector<256x128xf32>
    %2 = tpu.matmul %0, %1, %cst {dimension_numbers = #tpu.dot_dimension_numbers<[1], [0], [0], [1], [0, 0, 1, 1], [], []>} : vector<256x24xf32>, vector<24x128xf32>, vector<256x128xf32> -> vector<256x128xf32>
    %c0_3 = arith.constant 0 : index
    %c0_4 = arith.constant 0 : index
    %3 = vector.load %arg3[%c0_3, %c0_4] : memref<1x128xf32, #tpu.memory_space<vmem>>, vector<1x128xf32>
    %4 = vector.broadcast %3 : vector<1x128xf32> to vector<256x128xf32>
    %5 = arith.addf %2, %4 : vector<256x128xf32>
    %cst_5 = arith.constant 0.000000e+00 : f32
    %6 = vector.broadcast %cst_5 : f32 to vector<256x128xf32>
    %7 = arith.maximumf %5, %6 : vector<256x128xf32>
    %c0_6 = arith.constant 0 : index
    %c0_7 = arith.constant 0 : index
    %8 = vector.load %arg4[%c0_6, %c0_7] : memref<128x256xf32, #tpu.memory_space<vmem>>, vector<128x256xf32>
    %cst_8 = arith.constant dense<0.000000e+00> : vector<256x256xf32>
    %9 = tpu.matmul %7, %8, %cst_8 {dimension_numbers = #tpu.dot_dimension_numbers<[1], [0], [0], [1], [0, 0, 1, 1], [], []>} : vector<256x128xf32>, vector<128x256xf32>, vector<256x256xf32> -> vector<256x256xf32>
    %c0_9 = arith.constant 0 : index
    %c0_10 = arith.constant 0 : index
    %10 = vector.load %arg5[%c0_9, %c0_10] : memref<1x256xf32, #tpu.memory_space<vmem>>, vector<1x256xf32>
    %11 = vector.broadcast %10 : vector<1x256xf32> to vector<256x256xf32>
    %12 = arith.addf %9, %11 : vector<256x256xf32>
    %cst_11 = arith.constant 0.000000e+00 : f32
    %13 = vector.broadcast %cst_11 : f32 to vector<256x256xf32>
    %14 = arith.maximumf %12, %13 : vector<256x256xf32>
    %c0_12 = arith.constant 0 : index
    %c0_13 = arith.constant 0 : index
    %15 = vector.load %arg6[%c0_12, %c0_13] : memref<256x384xf32, #tpu.memory_space<vmem>>, vector<256x384xf32>
    %cst_14 = arith.constant dense<0.000000e+00> : vector<256x384xf32>
    %16 = tpu.matmul %14, %15, %cst_14 {dimension_numbers = #tpu.dot_dimension_numbers<[1], [0], [0], [1], [0, 0, 1, 1], [], []>} : vector<256x256xf32>, vector<256x384xf32>, vector<256x384xf32> -> vector<256x384xf32>
    %c0_15 = arith.constant 0 : index
    %c0_16 = arith.constant 0 : index
    %17 = vector.load %arg7[%c0_15, %c0_16] : memref<1x384xf32, #tpu.memory_space<vmem>>, vector<1x384xf32>
    %18 = vector.broadcast %17 : vector<1x384xf32> to vector<256x384xf32>
    %19 = arith.addf %16, %18 : vector<256x384xf32>
    %c0_17 = arith.constant 0 : index
    %c0_18 = arith.constant 0 : index
    %20 = vector.load %arg8[%c0_17, %c0_18] : memref<256x384xf32, #tpu.memory_space<vmem>>, vector<256x384xf32>
    tpu.vector_store %arg8[%c0_17, %c0_18], %19 {strides = array<i32>} : memref<256x384xf32, #tpu.memory_space<vmem>>, vector<256x384xf32>,
    return
  }
  func.func @transform_0(%arg0: i32) -> (i32, i32) {
    %c0_i32 = arith.constant 0 : i32
    %c0_i32_0 = arith.constant 0 : i32
    return %arg0, %c0_i32 : i32, i32
  }
  func.func @transform_1(%arg0: i32) -> (i32, i32) {
    %c0_i32 = arith.constant 0 : i32
    %c0_i32_0 = arith.constant 0 : i32
    %c0_i32_1 = arith.constant 0 : i32
    return %c0_i32, %c0_i32_0 : i32, i32
  }
  func.func @transform_2(%arg0: i32) -> (i32, i32) {
    %c0_i32 = arith.constant 0 : i32
    %c0_i32_0 = arith.constant 0 : i32
    %c0_i32_1 = arith.constant 0 : i32
    return %c0_i32, %c0_i32_0 : i32, i32
  }
  func.func @transform_3(%arg0: i32) -> (i32, i32) {
    %c0_i32 = arith.constant 0 : i32
    %c0_i32_0 = arith.constant 0 : i32
    %c0_i32_1 = arith.constant 0 : i32
    return %c0_i32, %c0_i32_0 : i32, i32
  }
  func.func @transform_4(%arg0: i32) -> (i32, i32) {
    %c0_i32 = arith.constant 0 : i32
    %c0_i32_0 = arith.constant 0 : i32
    %c0_i32_1 = arith.constant 0 : i32
    return %c0_i32, %c0_i32_0 : i32, i32
  }
  func.func @transform_5(%arg0: i32) -> (i32, i32) {
    %c0_i32 = arith.constant 0 : i32
    %c0_i32_0 = arith.constant 0 : i32
    %c0_i32_1 = arith.constant 0 : i32
    return %c0_i32, %c0_i32_0 : i32, i32
  }
  func.func @transform_6(%arg0: i32) -> (i32, i32) {
    %c0_i32 = arith.constant 0 : i32
    %c0_i32_0 = arith.constant 0 : i32
    %c0_i32_1 = arith.constant 0 : i32
    return %c0_i32, %c0_i32_0 : i32, i32
  }
  func.func @transform_7(%arg0: i32) -> (i32, i32) {
    %c0_i32 = arith.constant 0 : i32
    %c0_i32_0 = arith.constant 0 : i32
    return %arg0, %c0_i32 : i32, i32
  }
}

</mosaic_0001>

<bundles_post_ra>
// kernel: decoder_forward.1
= control target key start
LH: loop header
LB: loop body
LE: loop exit
PB: predicated region body
PF: predicated region fallthrough
CT: control target
= control target key end

     0   :  { %vm68_vm0 = vcmask 195584   ;;  %s3225_s1 = inlined_call_operand.vmem [shape: f32[24,128], index: 1, kind: input, shape index: {}]   ;;  %s3226_s0 = inlined_call_operand.vmem [shape: f32[256,24], index: 0, kind: input, shape index: {}]   ;;  %s3227_s3 = inlined_call_operand.vmem [shape: f32[128,256], index: 3, kind: input, shape index: {}]   ;;  %s3228_s2 = inlined_call_operand.vmem [shape: f32[1,128], index: 2, kind: input, shape index: {}]   ;;  %s3229_s5 = inlined_call_operand.vmem [shape: f32[256,384], index: 5, kind: input, shape index: {}]   ;;  %s3230_s4 = inlined_call_operand.vmem [shape: f32[1,256], index: 4, kind: input, shape index: {}]   ;;  %s3231_s6 = inlined_call_operand.vmem [shape: f32[1,384], index: 6, kind: input, shape index: {}]   ;;  %s3232_s7 = inlined_call_operand.vmem [shape: f32[256,384], index: 7, kind: output, shape index: {}]  }
   0x1   :  { %v58_v0 = vld [vmem:[%s3225_s1] sm:$0xff]  ;;  %v59_v1 = vld [vmem:[%s3225_s1 + $0x8] sm:$0xff]  ;;  %v60_v4 = vld [vmem:[%s3225_s1 + $0x10] sm:$0xff] }
   0x2   :  { %v1604_v2 = vpack.c.bf16 %v59_v1, %v58_v0  ;;  %v26_v3 = vld [vmem:[%s3226_s0] sm:$0xff]  ;;  %v27_v5 = vld [vmem:[%s3226_s0 + $0x8] sm:$0xff]  ;;  %v28_v6 = vld [vmem:[%s3226_s0 + $0x10] sm:$0xff] }
   0x3   :  { %1556 = vmatprep.mubr.msk.f32.mxu0 %vm68_vm0, %v26_v3  ;;  %v29_v7 = vld [vmem:[%s3226_s0 + $0x18] sm:$0xff]  ;;  %v30_v8 = vld [vmem:[%s3226_s0 + $0x20] sm:$0xff]  ;;  %v423_v9 = vld [vmem:[%s3227_s3 + $0x8] sm:$0xff] }
   0x4   :  { %1605 = vmatprep.subr.bf16.mxu0 %v1604_v2  ;;  %v31_v10 = vld [vmem:[%s3226_s0 + $0x28] sm:$0xff]  ;;  %v425_v11 = vld [vmem:[%s3227_s3 + $0x18] sm:$0xff]  ;;  %v422_v12 = vld [vmem:[%s3227_s3] sm:$0xff] }
   0x5   :  { %1607 = vmatpush3.bf16.msra.mxu0 %v1604_v2  ;;  %v424_v13 = vld [vmem:[%s3227_s3 + $0x10] sm:$0xff]  ;;  %v1608_v14 = vpack.c.bf16 %v425_v11, %v423_v9  ;;  %v427_v16 = vld [vmem:[%s3227_s3 + $0x28] sm:$0xff]  ;;  %v429_v17 = vld [vmem:[%s3227_s3 + $0x38] sm:$0xff] }
   0x6   :  { %1554 = vmatprep.subr.mxu0 %v60_v4  ;;  %v1610_v15 = vpack.c.bf16 %v424_v13, %v422_v12  ;;  %v426_v18 = vld [vmem:[%s3227_s3 + $0x20] sm:$0xff]  ;;  %v1612_v19 = vpack.c.bf16 %v429_v17, %v427_v16  ;;  %v428_v20 = vld [vmem:[%s3227_s3 + $0x30] sm:$0xff]  ;;  %v431_v21 = vld [vmem:[%s3227_s3 + $0x48] sm:$0xff] }
   0x7   :  { %v433_v22 = vld [vmem:[%s3227_s3 + $0x58] sm:$0xff]  ;;  %v32_v23 = vld [vmem:[%s3226_s0 + $0x30] sm:$0xff]  ;;  %1609 = vmatprep.subr.bf16.mxu1 %v1608_v14  ;;  %v1614_v24 = vpack.c.bf16 %v428_v20, %v426_v18  ;;  %v430_v26 = vld [vmem:[%s3227_s3 + $0x40] sm:$0xff]  ;;  %v1786_v20 = vmov 0.0  }
   0x8   :  { %1611 = vmatpush1.bf16.msra.mxu1 %v1610_v15  ;;  %v1616_v25 = vpack.c.bf16 %v433_v22, %v431_v21  ;;  %v432_v27 = vld [vmem:[%s3227_s3 + $0x50] sm:$0xff]  ;;  %v33_v28 = vld [vmem:[%s3226_s0 + $0x38] sm:$0xff]  ;;  %v435_v29 = vld [vmem:[%s3227_s3 + $0x68] sm:$0xff]  ;;  %530 = vmatprep.mubr.f32.mxu1 %v1786_v20 }
   0x9   :  { %1555 = vmatpush3.msra.mxu0 %v60_v4  ;;  %1613 = vmatprep.subr.bf16.mxu1 %v1612_v19  ;;  %v437_v30 = vld [vmem:[%s3227_s3 + $0x78] sm:$0xff]  ;;  %v34_v31 = vld [vmem:[%s3226_s0 + $0x40] sm:$0xff]  ;;  %v1618_v32 = vpack.c.bf16 %v432_v27, %v430_v26  ;;  %v436_v35 = vld [vmem:[%s3227_s3 + $0x70] sm:$0xff] }
   0xa   :  { %1557 = vmatmul.mubr.msk.f32.vlgmr.msra.gmra.mrb[0].mxu0 %vm68_vm0, %v27_v5  ;;  %v1620_v33 = vpack.c.bf16 %v437_v30, %v435_v29  ;;  %v434_v34 = vld [vmem:[%s3227_s3 + $0x60] sm:$0xff]  ;;  %v35_v36 = vld [vmem:[%s3226_s0 + $0x48] sm:$0xff]  ;;  %v441_v38 = vld [vmem:[%s3227_s3 + $0x98] sm:$0xff] }
   0xb   :  { %1559 = vmatprep.mubr.msk.f32.mxu0 %vm68_vm0, %v28_v6  ;;  %v439_v37 = vld [vmem:[%s3227_s3 + $0x88] sm:$0xff]  ;;  %v36_v39 = vld [vmem:[%s3226_s0 + $0x50] sm:$0xff]  ;;  %v1622_v40 = vpack.c.bf16 %v436_v35, %v434_v34  ;;  %v438_v42 = vld [vmem:[%s3227_s3 + $0x80] sm:$0xff] }
   0xc   :  { %1615 = vmatpush1.bf16.msra.mxu1 %v1614_v24  ;;  %v1624_v41 = vpack.c.bf16 %v441_v38, %v439_v37  ;;  %v440_v43 = vld [vmem:[%s3227_s3 + $0x90] sm:$0xff]  ;;  %v37_v44 = vld [vmem:[%s3226_s0 + $0x58] sm:$0xff]  ;;  %v443_v45 = vld [vmem:[%s3227_s3 + $0xa8] sm:$0xff] }
   0xd   :  { %1617 = vmatprep.subr.bf16.mxu1 %v1616_v25  ;;  %v445_v46 = vld [vmem:[%s3227_s3 + $0xb8] sm:$0xff]  ;;  %v38_v47 = vld [vmem:[%s3226_s0 + $0x60] sm:$0xff]  ;;  %v1626_v48 = vpack.c.bf16 %v440_v43, %v438_v42  ;;  %v444_v51 = vld [vmem:[%s3227_s3 + $0xb0] sm:$0xff] }
   0xe   :  { %1560 = vmatmul.mubr.msk.f32.gmra.mrb[2].mxu0 %vm68_vm0, %v29_v7  ;;  %v1628_v49 = vpack.c.bf16 %v445_v46, %v443_v45  ;;  %v442_v50 = vld [vmem:[%s3227_s3 + $0xa0] sm:$0xff]  ;;  %v39_v52 = vld [vmem:[%s3226_s0 + $0x68] sm:$0xff]  ;;  %v449_v54 = vld [vmem:[%s3227_s3 + $0xd8] sm:$0xff] }
   0xf   :  { %1562 = vmatprep.mubr.msk.f32.mxu0 %vm68_vm0, %v30_v8  ;;  %v447_v53 = vld [vmem:[%s3227_s3 + $0xc8] sm:$0xff]  ;;  %v40_v55 = vld [vmem:[%s3226_s0 + $0x70] sm:$0xff]  ;;  %v1630_v56 = vpack.c.bf16 %v444_v51, %v442_v50  ;;  %v446_v58 = vld [vmem:[%s3227_s3 + $0xc0] sm:$0xff] }
  0x10   :  { %1619 = vmatpush1.bf16.msra.mxu1 %v1618_v32  ;;  %v1632_v57 = vpack.c.bf16 %v449_v54, %v447_v53  ;;  %v448_v59 = vld [vmem:[%s3227_s3 + $0xd0] sm:$0xff]  ;;  %v41_v60 = vld [vmem:[%s3226_s0 + $0x78] sm:$0xff]  ;;  %v42_v61 = vld [vmem:[%s3226_s0 + $0x80] sm:$0xff] }
  0x11   :  { %1621 = vmatprep.subr.bf16.mxu1 %v1620_v33  ;;  %v1634_v62 = vpack.c.bf16 %v448_v59, %v446_v58  ;;  %v43_v63 = vld [vmem:[%s3226_s0 + $0x88] sm:$0xff]  ;;  %v44_v0 = vld [vmem:[%s3226_s0 + $0x90] sm:$0xff]  ;;  %v45_v1 = vld [vmem:[%s3226_s0 + $0x98] sm:$0xff] }
  0x12   :  { %1563 = vmatmul.mubr.msk.f32.gmra.mrb[4].mxu0 %vm68_vm0, %v31_v10  ;;  %v46_v2 = vld [vmem:[%s3226_s0 + $0xa0] sm:$0xff]  ;;  %v47_v3 = vld [vmem:[%s3226_s0 + $0xa8] sm:$0xff]  ;;  %v48_v4 = vld [vmem:[%s3226_s0 + $0xb0] sm:$0xff] }
  0x13   :  { %1565 = vmatprep.mubr.msk.f32.mxu0 %vm68_vm0, %v32_v23  ;;  %v49_v5 = vld [vmem:[%s3226_s0 + $0xb8] sm:$0xff]  ;;  %v50_v6 = vld [vmem:[%s3226_s0 + $0xc0] sm:$0xff]  ;;  %v51_v7 = vld [vmem:[%s3226_s0 + $0xc8] sm:$0xff] }
  0x14   :  { %1623 = vmatpush1.bf16.msra.mxu1 %v1622_v40  ;;  %v52_v8 = vld [vmem:[%s3226_s0 + $0xd0] sm:$0xff]  ;;  %v53_v9 = vld [vmem:[%s3226_s0 + $0xd8] sm:$0xff]  ;;  %v54_v10 = vld [vmem:[%s3226_s0 + $0xe0] sm:$0xff] }
  0x15   :  { %1625 = vmatprep.subr.bf16.mxu1 %v1624_v41  ;;  %v55_v11 = vld [vmem:[%s3226_s0 + $0xe8] sm:$0xff]  ;;  %v56_v12 = vld [vmem:[%s3226_s0 + $0xf0] sm:$0xff]  ;;  %v57_v13 = vld [vmem:[%s3226_s0 + $0xf8] sm:$0xff] }
  0x16   :  { %1566 = vmatmul.mubr.msk.f32.gmra.mrb[6].mxu0 %vm68_vm0, %v33_v28  ;;  %v451_v14 = vld [vmem:[%s3227_s3 + $0xe8] sm:$0xff]  ;;  %v453_v15 = vld [vmem:[%s3227_s3 + $0xf8] sm:$0xff]  ;;  %v450_v17 = vld [vmem:[%s3227_s3 + $0xe0] sm:$0xff]  ;;  %v1787_v28 = vmov 0.0|0.0  }
  0x17   :  { %1568 = vmatprep.mubr.msk.f32.mxu0 %vm68_vm0, %v34_v31  ;;  %v1636_v16 = vpack.c.bf16 %v453_v15, %v451_v14  ;;  %v452_v18 = vld [vmem:[%s3227_s3 + $0xf0] sm:$0xff]  ;;  %v2065_v21 = vld [vmem:[%s3228_s2] ss:$0 sm:$0xff]  ;;  %v788_v25 = vld [vmem:[%s3229_s5 + $0x8] sm:$0xff] }
  0x18   :  { %1627 = vmatpush1.bf16.msra.mxu1 %v1626_v48  ;;  %v1638_v19 = vpack.c.bf16 %v452_v18, %v450_v17  ;;  %v791_v26 = vld [vmem:[%s3229_s5 + $0x20] sm:$0xff]  ;;  %v790_v33 = vld [vmem:[%s3229_s5 + $0x18] sm:$0xff]  ;;  %v797_v35 = vld [vmem:[%s3229_s5 + $0x50] sm:$0xff] }
  0x19   :  { %1629 = vmatprep.subr.bf16.mxu1 %v1628_v49  ;;  %v787_v27 = vld [vmem:[%s3229_s5] sm:$0xff]  ;;  %v1640_v32 = vpack.c.bf16 %v791_v26, %v788_v25  ;;  %v794_v34 = vld [vmem:[%s3229_s5 + $0x38] sm:$0xff]  ;;  %v796_v40 = vld [vmem:[%s3229_s5 + $0x48] sm:$0xff] }
  0x1a   :  { %1569 = vmatmul.mubr.msk.f32.gmra.mrb[8].mxu0 %vm68_vm0, %v35_v36  ;;  %v1642_v37 = vpack.c.bf16 %v790_v33, %v787_v27  ;;  %v1644_v38 = vpack.c.bf16 %v797_v35, %v794_v34  ;;  %v800_v41 = vld [vmem:[%s3229_s5 + $0x68] sm:$0xff]  ;;  %v803_v43 = vld [vmem:[%s3229_s5 + $0x80] sm:$0xff]  ;;  %v802_v49 = vld [vmem:[%s3229_s5 + $0x78] sm:$0xff] }
  0x1b   :  { %1571 = vmatprep.mubr.msk.f32.mxu0 %vm68_vm0, %v36_v39  ;;  %v793_v39 = vld [vmem:[%s3229_s5 + $0x30] sm:$0xff]  ;;  %1641 = vmatprep.subr.bf16.mxu0 %v1640_v32  ;;  %v799_v48 = vld [vmem:[%s3229_s5 + $0x60] sm:$0xff]  ;;  %v806_v51 = vld [vmem:[%s3229_s5 + $0x98] sm:$0xff] }
  0x1c   :  { %1631 = vmatpush1.bf16.msra.mxu1 %v1630_v56  ;;  %1643 = vmatpush1.bf16.msra.mxu0 %v1642_v37  ;;  %v1650_v54 = vpack.c.bf16 %v802_v49, %v799_v48  ;;  %v808_v59 = vld [vmem:[%s3229_s5 + $0xa8] sm:$0xff]  ;;  %v801_v17 = vld [vmem:[%s3229_s5 + $0x70] sm:$0xff]  ;;  %v807_v32 = vld [vmem:[%s3229_s5 + $0xa0] sm:$0xff] }
  0x1d   :  { %1633 = vmatprep.subr.bf16.mxu1 %v1632_v57  ;;  %1645 = vmatprep.subr.bf16.mxu0 %v1644_v38  ;;  %v804_v18 = vld [vmem:[%s3229_s5 + $0x88] sm:$0xff]  ;;  %v810_v33 = vld [vmem:[%s3229_s5 + $0xb8] sm:$0xff]  ;;  %v823_v38 = vld [vmem:[%s3229_s5 + $0x120] sm:$0xff] }
  0x1e   :  { %1572 = vmatmul.mubr.msk.f32.gmra.mrb[10].mxu0 %vm68_vm0, %v37_v44  ;;  %v1646_v44 = vpack.c.bf16 %v796_v40, %v793_v39  ;;  %v820_v25 = vld [vmem:[%s3229_s5 + $0x108] sm:$0xff]  ;;  %v2183_v26 = vpack.c.bf16 %v804_v18, %v801_v17  ;;  %v826_v39 = vld [vmem:[%s3229_s5 + $0x138] sm:$0xff]  ;;  %v2211_v40 = vpack.c.bf16 %v810_v33, %v807_v32 }
  0x1f   :  { %1574 = vmatprep.mubr.msk.f32.mxu0 %vm68_vm0, %v38_v47  ;;  %v1648_v47 = vpack.c.bf16 %v803_v43, %v800_v41  ;;  %v833_v43 = vld [vmem:[%s3229_s5 + $0x170] sm:$0xff]  ;;  %v848_v17 = vld [vmem:[%s3229_s5 + $0x1e8] sm:$0xff]  ;;  %v854_v33 = vld [vmem:[%s3229_s5 + $0x218] sm:$0xff] }
  0x20   :  { %1635 = vmatpush1.bf16.msra.mxu1 %v1634_v62  ;;  %1647 = vmatpush1.bf16.msra.mxu0 %v1646_v44  ;;  %v813_v44 = vld [vmem:[%s3229_s5 + $0xd0] sm:$0xff] }
  0x21   :  { %1637 = vmatprep.subr.bf16.mxu1 %v1636_v16  ;;  %1649 = vmatprep.subr.bf16.mxu0 %v1648_v47  ;;  %v1666_v47 = vpack.c.bf16 %v826_v39, %v823_v38 }
  0x22   :  { %1575 = vmatmul.mubr.msk.f32.gmra.mrb[12].mxu0 %vm68_vm0, %v39_v52  ;;  %v809_v52 = vld [vmem:[%s3229_s5 + $0xb0] sm:$0xff] }
  0x23   :  { %1577 = vmatprep.mubr.msk.f32.mxu0 %vm68_vm0, %v40_v55  ;;  %v805_v55 = vld [vmem:[%s3229_s5 + $0x90] sm:$0xff]  ;;  %v1652_v58 = vpack.c.bf16 %v809_v52, %v806_v51  ;;  %v832_v52 = vld [vmem:[%s3229_s5 + $0x168] sm:$0xff] }
  0x24   :  { %1639 = vmatpush1.bf16.msra.mxu1 %v1638_v19  ;;  %1651 = vmatpush1.bf16.msra.mxu0 %v1650_v54  ;;  %v829_v51 = vld [vmem:[%s3229_s5 + $0x150] sm:$0xff] }
  0x25   :  { %1752 = vmatprep.subr.bf16.mxu1 %v1787_v28  ;;  %1653 = vmatprep.subr.bf16.mxu0 %v1652_v58  ;;  %v1670_v58 = vpack.c.bf16 %v832_v52, %v829_v51 }
  0x26   :  { %1578 = vmatmul.mubr.msk.f32.gmra.mrb[14].mxu0 %vm68_vm0, %v41_v60  ;;  %v789_v60 = vld [vmem:[%s3229_s5 + $0x10] sm:$0xff] }
  0x27   :  { %1580 = vmatprep.mubr.msk.f32.mxu0 %vm68_vm0, %v42_v61  ;;  %v792_v61 = vld [vmem:[%s3229_s5 + $0x28] sm:$0xff] }
  0x2a   :  { %1581 = vmatmul.mubr.msk.f32.gmra.mrb[16].mxu0 %vm68_vm0, %v43_v63  ;;  %v812_v63 = vld [vmem:[%s3229_s5 + $0xc8] sm:$0xff] }
  0x2b   :  { %1583 = vmatprep.mubr.msk.f32.mxu0 %vm68_vm0, %v44_v0  ;;  %v815_v0 = vld [vmem:[%s3229_s5 + $0xe0] sm:$0xff] }
  0x2e   :  { %1584 = vmatmul.mubr.msk.f32.gmra.mrb[18].mxu0 %vm68_vm0, %v45_v1  ;;  %v2136_v1 = vpack.c.bf16 %v792_v61, %v789_v60 }
  0x2f   :  { %1586 = vmatprep.mubr.msk.f32.mxu0 %vm68_vm0, %v46_v2 }
  0x32   :  { %1587 = vmatmul.mubr.msk.f32.gmra.mrb[20].mxu0 %vm68_vm0, %v47_v3  ;;  %v1654_v3 = vpack.c.bf16 %v808_v59, %v805_v55  ;;  %v836_v55 = vld [vmem:[%s3229_s5 + $0x188] sm:$0xff] }
  0x33   :  { %1589 = vmatprep.mubr.msk.f32.mxu0 %vm68_vm0, %v48_v4  ;;  %v795_v4 = vld [vmem:[%s3229_s5 + $0x40] sm:$0xff] }
  0x34   :  { %1655 = vmatpush1.bf16.msra.mxu0 %v1654_v3  ;;  %v842_v3 = vld [vmem:[%s3229_s5 + $0x1b8] sm:$0xff] }
  0x36   :  { %1590 = vmatmul.mubr.msk.f32.gmra.mrb[22].mxu0 %vm68_vm0, %v49_v5 }
  0x37   :  { %1592 = vmatprep.mubr.msk.f32.mxu0 %vm68_vm0, %v50_v6 }
  0x3a   :  { %1593 = vmatmul.mubr.msk.f32.gmra.mrb[24].mxu0 %vm68_vm0, %v51_v7  ;;  %v1656_v7 = vpack.c.bf16 %v815_v0, %v812_v63  ;;  %v838_v63 = vld [vmem:[%s3229_s5 + $0x198] sm:$0xff] }
  0x3b   :  { %1595 = vmatprep.mubr.msk.f32.mxu0 %vm68_vm0, %v52_v8  ;;  %v811_v8 = vld [vmem:[%s3229_s5 + $0xc0] sm:$0xff] }
  0x3c   :  { %1657 = vmatprep.subr.bf16.mxu0 %v1656_v7 }
  0x3e   :  { %1596 = vmatmul.mubr.msk.f32.gmra.mrb[26].mxu0 %vm68_vm0, %v53_v9  ;;  %v814_v9 = vld [vmem:[%s3229_s5 + $0xd8] sm:$0xff] }
  0x3f   :  { %1598 = vmatprep.mubr.msk.f32.mxu0 %vm68_vm0, %v54_v10  ;;  %v798_v10 = vld [vmem:[%s3229_s5 + $0x58] sm:$0xff]  ;;  %v1658_v16 = vpack.c.bf16 %v814_v9, %v811_v8 }
  0x40   :  { %v2164_v14 = vpack.c.bf16 %v798_v10, %v795_v4  ;;  %v845_v4 = vld [vmem:[%s3229_s5 + $0x1d0] sm:$0xff] }
  0x41   :  { %1659 = vmatpush1.bf16.msra.mxu0 %v1658_v16 }
  0x42   :  { %1599 = vmatmul.mubr.msk.f32.gmra.mrb[28].mxu0 %vm68_vm0, %v55_v11 }
  0x43   :  { %1601 = vmatprep.mubr.msk.f32.mxu0 %vm68_vm0, %v56_v12  ;;  %v818_v12 = vld [vmem:[%s3229_s5 + $0xf8] sm:$0xff] }
  0x46   :  { %1602 = vmatmul.mubr.msk.f32.gmra.mrb[30].mxu0 %vm68_vm0, %v57_v13  ;;  %v821_v13 = vld [vmem:[%s3229_s5 + $0x110] sm:$0xff] }
  0xdd   :  { %v1558_v22 = vpop.f32.mrb[0].mxu0 }
  0xde   :  { %v231_v23 = vpop.f32.mrb[1].mxu0  ;;  %v237_v29 = vadd.f32 %v1558_v22, %v2065_v21 }
  0xdf   :  { %v232_v24 = vadd.f32 %v2065_v21, %v231_v23  ;;  %v1660_v23 = vpack.c.bf16 %v821_v13, %v818_v12  ;;  %v841_v12 = vld [vmem:[%s3229_s5 + $0x1b0] sm:$0xff]  ;;  %v844_v13 = vld [vmem:[%s3229_s5 + $0x1c8] sm:$0xff] }
  0xe0   :  { %v391_v45 = vmax.f32 %v237_v29, 0.0  ;;  %v824_v29 = vld [vmem:[%s3229_s5 + $0x128] sm:$0xff] }
  0xe1   :  { %v390_v30 = vmax.f32 %v232_v24, 0.0  ;;  %v1561_v31 = vpop.f32.mrb[2].mxu0  ;;  %v817_v24 = vld [vmem:[%s3229_s5 + $0xf0] sm:$0xff]  ;;  %1661 = vmatprep.subr.bf16.mxu0 %v1660_v23  ;;  %v1678_v23 = vpack.c.bf16 %v844_v13, %v841_v12  ;;  %v872_v13 = vld [vmem:[%s3229_s5 + $0x2a8] sm:$0xff] }
  0xe2   :  { %v241_v36 = vpop.f32.mrb[3].mxu0  ;;  %v247_v56 = vadd.f32 %v1561_v31, %v2065_v21  ;;  %v1662_v34 = vpack.c.bf16 %v820_v25, %v817_v24 }
  0xe3   :  { %531 = vmatmul.mubr.f32.vlgmr.msra.gmra.mrb[0].mxu1 %v390_v30  ;;  %v242_v42 = vadd.f32 %v2065_v21, %v241_v36  ;;  %v827_v30 = vld [vmem:[%s3229_s5 + $0x140] sm:$0xff] }
  0xe4   :  { %536 = vmatprep.mubr.f32.mxu1 %v1786_v20  ;;  %v393_v5 = vmax.f32 %v247_v56, 0.0  ;;  %1768 = vmatpush1.bf16.msra.mxu1 %v2136_v1  ;;  %v1664_v37 = vpack.c.bf16 %v827_v30, %v824_v29  ;;  %v839_v56 = vld [vmem:[%s3229_s5 + $0x1a0] sm:$0xff] }
  0xe5   :  { %v1564_v46 = vpop.f32.mrb[4].mxu0  ;;  %v392_v53 = vmax.f32 %v242_v42, 0.0  ;;  %1753 = vmatprep.subr.bf16.mxu1 %v1787_v28  ;;  %v830_v42 = vld [vmem:[%s3229_s5 + $0x158] sm:$0xff]  ;;  %1663 = vmatpush1.bf16.msra.mxu0 %v1662_v34  ;;  %v1672_v61 = vpack.c.bf16 %v839_v56, %v836_v55  ;;  %v847_v30 = vld [vmem:[%s3229_s5 + $0x1e0] sm:$0xff]  ;;  %v857_v34 = vld [vmem:[%s3229_s5 + $0x230] sm:$0xff] }
  0xe6   :  { %v251_v50 = vpop.f32.mrb[5].mxu0  ;;  %v257_v19 = vadd.f32 %v1564_v46, %v2065_v21  ;;  %v816_v46 = vld [vmem:[%s3229_s5 + $0xe8] sm:$0xff]  ;;  %1665 = vmatprep.subr.bf16.mxu0 %v1664_v37 }
  0xe7   :  { %537 = vmatmul.mubr.f32.gmra.mrb[2].mxu1 %v391_v45  ;;  %v252_v2 = vadd.f32 %v2065_v21, %v251_v50  ;;  %v1668_v50 = vpack.c.bf16 %v833_v43, %v830_v42  ;;  %v1684_v43 = vpack.c.bf16 %v857_v34, %v854_v33 }
  0xe8   :  { %542 = vmatprep.mubr.f32.mxu1 %v1786_v20  ;;  %1769 = vmatpush1.bf16.msra.mxu1 %v2164_v14  ;;  %v395_v35 = vmax.f32 %v257_v19, 0.0 }
  0xe9   :  { %v2119_v57 = vpop.f32.mrb[6].mxu0  ;;  %v394_v15 = vmax.f32 %v252_v2, 0.0  ;;  %1754 = vmatprep.subr.bf16.mxu1 %v1787_v28  ;;  %1667 = vmatpush1.bf16.msra.mxu0 %v1666_v47 }
  0xea   :  { %v261_v62 = vpop.f32.mrb[7].mxu0  ;;  %v267_v48 = vadd.f32 %v2119_v57, %v2065_v21  ;;  %1669 = vmatprep.subr.bf16.mxu0 %v1668_v50 }
  0xeb   :  { %543 = vmatmul.mubr.f32.gmra.mrb[4].mxu1 %v392_v53  ;;  %v262_v31 = vadd.f32 %v2065_v21, %v261_v62  ;;  %v2240_v53 = vpack.c.bf16 %v816_v46, %v813_v44  ;;  %v835_v62 = vld [vmem:[%s3229_s5 + $0x180] sm:$0xff]  ;;  %v853_v44 = vld [vmem:[%s3229_s5 + $0x210] sm:$0xff] }
  0xec   :  { %548 = vmatprep.mubr.f32.mxu1 %v1786_v20  ;;  %1770 = vmatpush1.bf16.msra.mxu1 %v2183_v26  ;;  %v397_v59 = vmax.f32 %v267_v48, 0.0  ;;  %v1674_v8 = vpack.c.bf16 %v838_v63, %v835_v62  ;;  %v860_v48 = vld [vmem:[%s3229_s5 + $0x248] sm:$0xff]  ;;  %v869_v62 = vld [vmem:[%s3229_s5 + $0x290] sm:$0xff] }
  0xed   :  { %v2143_v6 = vpop.f32.mrb[8].mxu0  ;;  %1755 = vmatprep.subr.bf16.mxu1 %v1787_v28  ;;  %v396_v45 = vmax.f32 %v262_v31, 0.0  ;;  %1671 = vmatpush1.bf16.msra.mxu0 %v1670_v58  ;;  %v850_v31 = vld [vmem:[%s3229_s5 + $0x1f8] sm:$0xff]  ;;  %v859_v58 = vld [vmem:[%s3229_s5 + $0x240] sm:$0xff] }
  0xee   :  { %v2155_v11 = vpop.f32.mrb[9].mxu0  ;;  %v277_v9 = vadd.f32 %v2143_v6, %v2065_v21  ;;  %1673 = vmatprep.subr.bf16.mxu0 %v1672_v61  ;;  %v851_v6 = vld [vmem:[%s3229_s5 + $0x200] sm:$0xff]  ;;  %v1682_v38 = vpack.c.bf16 %v850_v31, %v847_v30  ;;  %v866_v61 = vld [vmem:[%s3229_s5 + $0x278] sm:$0xff] }
  0xef   :  { %549 = vmatmul.mubr.f32.gmra.mrb[6].mxu1 %v393_v5  ;;  %v272_v57 = vadd.f32 %v2065_v21, %v2155_v11  ;;  %v1676_v11 = vpack.c.bf16 %v845_v4, %v842_v3  ;;  %v1680_v29 = vpack.c.bf16 %v851_v6, %v848_v17 }
  0xf0   :  { %554 = vmatprep.mubr.f32.mxu1 %v1786_v20  ;;  %1771 = vmatpush1.bf16.msra.mxu1 %v2211_v40  ;;  %v399_v24 = vmax.f32 %v277_v9, 0.0  ;;  %v865_v9 = vld [vmem:[%s3229_s5 + $0x270] sm:$0xff] }
  0xf1   :  { %v2174_v22 = vpop.f32.mrb[10].mxu0  ;;  %1756 = vmatprep.subr.bf16.mxu1 %v1787_v28  ;;  %v398_v5 = vmax.f32 %v272_v57, 0.0  ;;  %1675 = vmatpush1.bf16.msra.mxu0 %v1674_v8  ;;  %v1692_v8 = vpack.c.bf16 %v869_v62, %v866_v61 }
  0xf2   :  { %v2185_v27 = vpop.f32.mrb[11].mxu0  ;;  %1677 = vmatprep.subr.bf16.mxu0 %v1676_v11  ;;  %v287_v39 = vadd.f32 %v2174_v22, %v2065_v21  ;;  %v863_v22 = vld [vmem:[%s3229_s5 + $0x260] sm:$0xff] }
  0xf3   :  { %555 = vmatmul.mubr.f32.gmra.mrb[8].mxu1 %v394_v15  ;;  %v282_v18 = vadd.f32 %v2065_v21, %v2185_v27  ;;  %v1688_v57 = vpack.c.bf16 %v863_v22, %v860_v48  ;;  %v877_v48 = vld [vmem:[%s3229_s5 + $0x2d0] sm:$0xff] }
  0xf4   :  { %560 = vmatprep.mubr.f32.mxu1 %v1786_v20  ;;  %1772 = vmatpush1.bf16.msra.mxu1 %v2240_v53  ;;  %v401_v55 = vmax.f32 %v287_v39, 0.0 }
  0xf5   :  { %v2202_v36 = vpop.f32.mrb[12].mxu0  ;;  %1757 = vmatprep.subr.bf16.mxu1 %v1787_v28  ;;  %1679 = vmatpush1.bf16.msra.mxu0 %v1678_v23 }
  0xf6   :  { %v2213_v41 = vpop.f32.mrb[13].mxu0  ;;  %1681 = vmatprep.subr.bf16.mxu0 %v1680_v29  ;;  %v297_v4 = vadd.f32 %v2202_v36, %v2065_v21  ;;  %v875_v36 = vld [vmem:[%s3229_s5 + $0x2c0] sm:$0xff]  ;;  %v874_v29 = vld [vmem:[%s3229_s5 + $0x2b8] sm:$0xff] }
  0xf7   :  { %561 = vmatmul.mubr.f32.gmra.mrb[10].mxu1 %v395_v35  ;;  %v400_v35 = vmax.f32 %v282_v18, 0.0  ;;  %v292_v50 = vadd.f32 %v2065_v21, %v2213_v41 }
  0xf8   :  { %566 = vmatprep.mubr.f32.mxu1 %v1786_v20  ;;  %v403_v18 = vmax.f32 %v297_v4, 0.0 }
  0xf9   :  { %v2231_v49 = vpop.f32.mrb[14].mxu0  ;;  %1683 = vmatpush1.bf16.msra.mxu0 %v1682_v38  ;;  %v402_v63 = vmax.f32 %v292_v50, 0.0  ;;  %v819_v50 = vld [vmem:[%s3229_s5 + $0x100] sm:$0xff] }
  0xfa   :  { %v2242_v54 = vpop.f32.mrb[15].mxu0  ;;  %1685 = vmatprep.subr.bf16.mxu0 %v1684_v43  ;;  %v307_v34 = vadd.f32 %v2231_v49, %v2065_v21 }
  0xfb   :  { %567 = vmatmul.mubr.f32.gmra.mrb[12].mxu1 %v396_v45  ;;  %v856_v45 = vld [vmem:[%s3229_s5 + $0x228] sm:$0xff] }
  0xfc   :  { %572 = vmatprep.mubr.f32.mxu1 %v1786_v20  ;;  %v1686_v52 = vpack.c.bf16 %v856_v45, %v853_v44  ;;  %v405_v43 = vmax.f32 %v307_v34, 0.0 }
  0xfd   :  { %v1582_v60 = vpop.f32.mrb[16].mxu0 }
  0xfe   :  { %v2262_v0 = vadd.f32 %v1582_v60, %v2065_v21  ;;  %v311_v2 = vpop.f32.mrb[17].mxu0  ;;  %1687 = vmatpush1.bf16.msra.mxu0 %v1686_v52 }
  0xff   :  { %573 = vmatmul.mubr.f32.gmra.mrb[14].mxu1 %v397_v59  ;;  %v2272_v7 = vadd.f32 %v2065_v21, %v311_v2  ;;  %v862_v59 = vld [vmem:[%s3229_s5 + $0x258] sm:$0xff]  ;;  %1689 = vmatprep.subr.bf16.mxu0 %v1688_v57  ;;  %v825_v57 = vld [vmem:[%s3229_s5 + $0x130] sm:$0xff] }
 0x100   :  { %578 = vmatprep.mubr.f32.mxu1 %v1786_v20  ;;  %v1690_v3 = vpack.c.bf16 %v862_v59, %v859_v58  ;;  %v407_v49 = vmax.f32 %v2262_v0, 0.0  ;;  %v828_v58 = vld [vmem:[%s3229_s5 + $0x148] sm:$0xff] }
 0x101   :  { %v1585_v10 = vpop.f32.mrb[18].mxu0  ;;  %v406_v44 = vmax.f32 %v2272_v7, 0.0  ;;  %v2451_v59 = vpack.c.bf16 %v828_v58, %v825_v57 }
 0x102   :  { %v2284_v15 = vadd.f32 %v1585_v10, %v2065_v21  ;;  %v321_v16 = vpop.f32.mrb[19].mxu0  ;;  %v868_v10 = vld [vmem:[%s3229_s5 + $0x288] sm:$0xff]  ;;  %1691 = vmatpush1.bf16.msra.mxu0 %v1690_v3 }
 0x103   :  { %579 = vmatmul.mubr.f32.gmra.mrb[16].mxu1 %v398_v5  ;;  %v2295_v19 = vadd.f32 %v2065_v21, %v321_v16  ;;  %v302_v16 = vadd.f32 %v2065_v21, %v2242_v54  ;;  %v1694_v6 = vpack.c.bf16 %v868_v10, %v865_v9  ;;  %1693 = vmatprep.subr.bf16.mxu0 %v1692_v8  ;;  %v840_v3 = vld [vmem:[%s3229_s5 + $0x1a8] sm:$0xff] }
 0x104   :  { %584 = vmatprep.mubr.f32.mxu1 %v1786_v20 }
 0x105   :  { %v1588_v25 = vpop.f32.mrb[20].mxu0  ;;  %v404_v31 = vmax.f32 %v302_v16, 0.0  ;;  %v408_v45 = vmax.f32 %v2295_v19, 0.0  ;;  %v878_v19 = vld [vmem:[%s3229_s5 + $0x2d8] sm:$0xff] }
 0x106   :  { %v2305_v27 = vadd.f32 %v1588_v25, %v2065_v21  ;;  %v331_v32 = vpop.f32.mrb[21].mxu0  ;;  %v871_v25 = vld [vmem:[%s3229_s5 + $0x2a0] sm:$0xff]  ;;  %1695 = vmatpush1.bf16.msra.mxu0 %v1694_v6  ;;  %v858_v16 = vld [vmem:[%s3229_s5 + $0x238] sm:$0xff] }
 0x107   :  { %585 = vmatmul.mubr.f32.gmra.mrb[18].mxu1 %v399_v24  ;;  %v2314_v37 = vadd.f32 %v2065_v21, %v331_v32  ;;  %v1696_v24 = vpack.c.bf16 %v875_v36, %v872_v13  ;;  %v1698_v33 = vpack.c.bf16 %v874_v29, %v871_v25  ;;  %v852_v13 = vld [vmem:[%s3229_s5 + $0x208] sm:$0xff]  ;;  %v867_v29 = vld [vmem:[%s3229_s5 + $0x280] sm:$0xff] }
 0x108   :  { %590 = vmatprep.mubr.f32.mxu1 %v1786_v20  ;;  %v411_v0 = vmax.f32 %v2305_v27, 0.0  ;;  %v880_v27 = vld [vmem:[%s3229_s5 + $0x2e8] sm:$0xff] }
 0x109   :  { %v1591_v42 = vpop.f32.mrb[22].mxu0  ;;  %1697 = vmatprep.subr.bf16.mxu0 %v1696_v24  ;;  %v410_v7 = vmax.f32 %v2314_v37, 0.0  ;;  %v1702_v22 = vpack.c.bf16 %v880_v27, %v877_v48  ;;  %v864_v24 = vld [vmem:[%s3229_s5 + $0x268] sm:$0xff] }
 0x10a   :  { %v2326_v46 = vadd.f32 %v1591_v42, %v2065_v21  ;;  %v341_v47 = vpop.f32.mrb[23].mxu0  ;;  %1699 = vmatpush1.bf16.msra.mxu0 %v1698_v33  ;;  %v876_v33 = vld [vmem:[%s3229_s5 + $0x2c8] sm:$0xff] }
 0x10b   :  { %591 = vmatmul.mubr.f32.gmra.mrb[20].mxu1 %v400_v35  ;;  %v2337_v51 = vadd.f32 %v2065_v21, %v341_v47  ;;  %v881_v47 = vld [vmem:[%s3229_s5 + $0x2f0] sm:$0xff] }
 0x10c   :  { %596 = vmatprep.mubr.f32.mxu1 %v1786_v20  ;;  %v1700_v37 = vpack.c.bf16 %v881_v47, %v878_v19 }
 0x10d   :  { %v1594_v56 = vpop.f32.mrb[24].mxu0 }
 0x10e   :  { %v2347_v41 = vadd.f32 %v1594_v56, %v2065_v21  ;;  %v351_v60 = vpop.f32.mrb[25].mxu0  ;;  %1701 = vmatprep.subr.bf16.mxu0 %v1700_v37 }
 0x10f   :  { %597 = vmatmul.mubr.f32.gmra.mrb[22].mxu1 %v401_v55  ;;  %v2356_v2 = vadd.f32 %v2065_v21, %v351_v60  ;;  %1703 = vmatpush1.bf16.msra.mxu0 %v1702_v22  ;;  %v413_v55 = vmax.f32 %v2326_v46, 0.0  ;;  %v831_v46 = vld [vmem:[%s3229_s5 + $0x160] sm:$0xff]  ;;  %v834_v60 = vld [vmem:[%s3229_s5 + $0x178] sm:$0xff] }
 0x110   :  { %602 = vmatprep.mubr.f32.mxu1 %v1786_v20  ;;  %1704 = vmatprep.subr.bf16.mxu0 %v1787_v28  ;;  %v2462_v61 = vpack.c.bf16 %v834_v60, %v831_v46  ;;  %v415_v62 = vmax.f32 %v2347_v41, 0.0  ;;  %v843_v41 = vld [vmem:[%s3229_s5 + $0x1c0] sm:$0xff] }
 0x111   :  { %v1597_v5 = vpop.f32.mrb[26].mxu0  ;;  %v414_v56 = vmax.f32 %v2356_v2, 0.0  ;;  %v837_v2 = vld [vmem:[%s3229_s5 + $0x190] sm:$0xff] }
 0x112   :  { %v2368_v11 = vadd.f32 %v1597_v5, %v2065_v21  ;;  %v361_v12 = vpop.f32.mrb[27].mxu0  ;;  %v2475_v4 = vpack.c.bf16 %v840_v3, %v837_v2  ;;  %v846_v5 = vld [vmem:[%s3229_s5 + $0x1d8] sm:$0xff] }
 0x113   :  { %603 = vmatmul.mubr.f32.gmra.mrb[24].mxu1 %v402_v63  ;;  %v2379_v17 = vadd.f32 %v2065_v21, %v361_v12  ;;  %v2486_v8 = vpack.c.bf16 %v846_v5, %v843_v41  ;;  %v849_v12 = vld [vmem:[%s3229_s5 + $0x1f0] sm:$0xff] }
 0x114   :  { %608 = vmatprep.mubr.f32.mxu1 %v1786_v20  ;;  %v417_v9 = vmax.f32 %v2368_v11, 0.0  ;;  %v2499_v36 = vpack.c.bf16 %v852_v13, %v849_v12  ;;  %v855_v11 = vld [vmem:[%s3229_s5 + $0x220] sm:$0xff] }
 0x115   :  { %v1600_v23 = vpop.f32.mrb[28].mxu0  ;;  %v416_v63 = vmax.f32 %v2379_v17, 0.0  ;;  %v2510_v17 = vpack.c.bf16 %v858_v16, %v855_v11 }
 0x116   :  { %v2389_v54 = vadd.f32 %v1600_v23, %v2065_v21  ;;  %v371_v30 = vpop.f32.mrb[29].mxu0  ;;  %v861_v23 = vld [vmem:[%s3229_s5 + $0x250] sm:$0xff] }
 0x117   :  { %609 = vmatmul.mubr.f32.gmra.mrb[26].mxu1 %v403_v18  ;;  %v2392_v32 = vadd.f32 %v2065_v21, %v371_v30  ;;  %v2523_v25 = vpack.c.bf16 %v864_v24, %v861_v23 }
 0x118   :  { %614 = vmatprep.mubr.f32.mxu1 %v1786_v20  ;;  %v419_v6 = vmax.f32 %v2389_v54, 0.0  ;;  %v870_v54 = vld [vmem:[%s3229_s5 + $0x298] sm:$0xff] }
 0x119   :  { %v1603_v35 = vpop.f32.mrb[30].mxu0  ;;  %v418_v10 = vmax.f32 %v2392_v32, 0.0  ;;  %v2534_v30 = vpack.c.bf16 %v870_v54, %v867_v29  ;;  %v873_v32 = vld [vmem:[%s3229_s5 + $0x2b0] sm:$0xff] }
 0x11a   :  { %v2398_v38 = vadd.f32 %v1603_v35, %v2065_v21  ;;  %v381_v39 = vpop.f32.mrb[31].mxu0  ;;  %v2545_v34 = vpack.c.bf16 %v876_v33, %v873_v32  ;;  %v882_v35 = vld [vmem:[%s3229_s5 + $0x2f8] sm:$0xff] }
 0x11b   :  { %615 = vmatmul.mubr.f32.gmra.mrb[28].mxu1 %v404_v31  ;;  %v2401_v42 = vadd.f32 %v2065_v21, %v381_v39  ;;  %v409_v21 = vmax.f32 %v2284_v15, 0.0  ;;  %v412_v15 = vmax.f32 %v2337_v51, 0.0  ;;  %v822_v51 = vld [vmem:[%s3229_s5 + $0x118] sm:$0xff]  ;;  %v456_v39 = vlaneseq }
 0x11c   :  { %620 = vmatprep.mubr.f32.mxu1 %v1786_v20  ;;  %v2438_v52 = vpack.c.bf16 %v822_v51, %v819_v50  ;;  %v421_v31 = vmax.f32 %v2398_v38, 0.0 }
 0x11d   :  { %v420_v18 = vmax.f32 %v2401_v42, 0.0  ;;  %v2558_v42 = vshrl.u32 %v456_v39, 7 }
 0x11e   :  { %1773 = vmatpush1.bf16.msra.mxu1 %v2438_v52 }
 0x11f   :  { %621 = vmatmul.mubr.f32.gmra.mrb[30].mxu1 %v405_v43  ;;  %1758 = vmatprep.subr.bf16.mxu1 %v1787_v28  ;;  %v3234_v43 = vsub.s32 0, %v2558_v42 }
 0x120   :  { %626 = vmatprep.mubr.f32.mxu1 %v1786_v20 }
 0x122   :  { %1774 = vmatpush1.bf16.msra.mxu1 %v2451_v59 }
 0x123   :  { %627 = vmatmul.mubr.f32.gmra.mrb[32].mxu1 %v406_v44  ;;  %1759 = vmatprep.subr.bf16.mxu1 %v1787_v28  ;;  %v454_v44 = vld [vmem:[%s3230_s4] sm:$0x3] }
 0x124   :  { %632 = vmatprep.mubr.f32.mxu1 %v1786_v20 }
 0x126   :  { %1775 = vmatpush1.bf16.msra.mxu1 %v2462_v61 }
 0x127   :  { %633 = vmatmul.mubr.f32.gmra.mrb[34].mxu1 %v407_v49  ;;  %1760 = vmatprep.subr.bf16.mxu1 %v1787_v28  ;;  %v3233_v49 = vsub.s32 1, %v2558_v42 }
 0x128   :  { %638 = vmatprep.mubr.f32.mxu1 %v1786_v20 }
 0x12a   :  { %1776 = vmatpush1.bf16.msra.mxu1 %v2475_v4 }
 0x12b   :  { %639 = vmatmul.mubr.f32.gmra.mrb[36].mxu1 %v408_v45  ;;  %1761 = vmatprep.subr.bf16.mxu1 %v1787_v28  ;;  %v2567_v45 = vrot.slane %v454_v44, %v3234_v43 }
 0x12c   :  { %644 = vmatprep.mubr.f32.mxu1 %v1786_v20 }
 0x12e   :  { %1777 = vmatpush1.bf16.msra.mxu1 %v2486_v8 }
 0x12f   :  { %645 = vmatmul.mubr.f32.gmra.mrb[38].mxu1 %v409_v21  ;;  %1762 = vmatprep.subr.bf16.mxu1 %v1787_v28  ;;  %v2571_v21 = vrot.slane %v454_v44, %v3233_v49 }
 0x130   :  { %650 = vmatprep.mubr.f32.mxu1 %v1786_v20 }
 0x132   :  { %1778 = vmatpush1.bf16.msra.mxu1 %v2499_v36 }
 0x133   :  { %651 = vmatmul.mubr.f32.gmra.mrb[40].mxu1 %v410_v7  ;;  %1763 = vmatprep.subr.bf16.mxu1 %v1787_v28 }
 0x134   :  { %656 = vmatprep.mubr.f32.mxu1 %v1786_v20 }
 0x136   :  { %1779 = vmatpush1.bf16.msra.mxu1 %v2510_v17 }
 0x137   :  { %657 = vmatmul.mubr.f32.gmra.mrb[42].mxu1 %v411_v0  ;;  %1764 = vmatprep.subr.bf16.mxu1 %v1787_v28 }
 0x138   :  { %662 = vmatprep.mubr.f32.mxu1 %v1786_v20 }
 0x13a   :  { %1780 = vmatpush1.bf16.msra.mxu1 %v2523_v25 }
 0x13b   :  { %663 = vmatmul.mubr.f32.gmra.mrb[44].mxu1 %v412_v15  ;;  %1765 = vmatprep.subr.bf16.mxu1 %v1787_v28 }
 0x13c   :  { %668 = vmatprep.mubr.f32.mxu1 %v1786_v20 }
 0x13e   :  { %1781 = vmatpush1.bf16.msra.mxu1 %v2534_v30 }
 0x13f   :  { %669 = vmatmul.mubr.f32.gmra.mrb[46].mxu1 %v413_v55  ;;  %1766 = vmatprep.subr.bf16.mxu1 %v1787_v28 }
 0x140   :  { %674 = vmatprep.mubr.f32.mxu1 %v1786_v20 }
 0x142   :  { %1782 = vmatpush1.bf16.msra.mxu1 %v2545_v34 }
 0x143   :  { %675 = vmatmul.mubr.f32.gmra.mrb[48].mxu1 %v414_v56  ;;  %1767 = vmatprep.subr.bf16.mxu1 %v1787_v28 }
 0x144   :  { %680 = vmatprep.mubr.f32.mxu1 %v1786_v20 }
 0x147   :  { %681 = vmatmul.mubr.f32.gmra.mrb[50].mxu1 %v415_v62 }
 0x148   :  { %686 = vmatprep.mubr.f32.mxu1 %v1786_v20 }
 0x14b   :  { %687 = vmatmul.mubr.f32.gmra.mrb[52].mxu1 %v416_v63 }
 0x14c   :  { %692 = vmatprep.mubr.f32.mxu1 %v1786_v20 }
 0x14f   :  { %693 = vmatmul.mubr.f32.gmra.mrb[54].mxu1 %v417_v9 }
 0x150   :  { %698 = vmatprep.mubr.f32.mxu1 %v1786_v20 }
 0x153   :  { %699 = vmatmul.mubr.f32.gmra.mrb[56].mxu1 %v418_v10 }
 0x154   :  { %704 = vmatprep.mubr.f32.mxu1 %v1786_v20 }
 0x157   :  { %705 = vmatmul.mubr.f32.gmra.mrb[58].mxu1 %v419_v6 }
 0x158   :  { %710 = vmatprep.mubr.f32.mxu1 %v1786_v20 }
 0x15b   :  { %711 = vmatmul.mubr.f32.gmra.mrb[60].mxu1 %v420_v18 }
 0x15c   :  { %716 = vmatprep.mubr.f32.mxu1 %v1786_v20  ;;  %v879_v20 = vld [vmem:[%s3229_s5 + $0x2e0] sm:$0xff] }
 0x15d   :  { %v2555_v38 = vpack.c.bf16 %v882_v35, %v879_v20 }
 0x15f   :  { %717 = vmatmul.mubr.f32.gmra.mrb[62].mxu1 %v421_v31 }
 0x160   :  { %1783 = vmatpush1.bf16.msra.mxu1 %v2555_v38 }
 0x1b6   :  { %v532_v7 = vpop.f32.mrb[0].mxu1 }
 0x1b7   :  { %v2574_v0 = vadd.f32 %v532_v7, %v2567_v45  ;;  %v534_v19 = vpop.f32.mrb[1].mxu1 }
 0x1b8   :  { %v2577_v47 = vadd.f32 %v534_v19, %v2571_v21 }
 0x1b9   :  { %v723_v48 = vmax.f32 %v2574_v0, 0.0  ;;  %v3237_v0 = vsub.s32 0, %v2558_v42 }
 0x1ba   :  { %v724_v15 = vmax.f32 %v2577_v47, 0.0  ;;  %v538_v37 = vpop.f32.mrb[2].mxu1 }
 0x1bb   :  { %v2582_v27 = vadd.f32 %v538_v37, %v2567_v45  ;;  %v540_v22 = vpop.f32.mrb[3].mxu1 }
 0x1bc   :  { %v2585_v50 = vadd.f32 %v540_v22, %v2571_v21  ;;  %964 = vmatprep.mubr.f32.mxu0 %v724_v15 }
 0x1bd   :  { %965 = vmatmul.mubr.f32.vlgmr.msra.gmra.mrb[32].mxu0 %v723_v48  ;;  %v725_v56 = vmax.f32 %v2582_v27, 0.0 }
 0x1be   :  { %v726_v51 = vmax.f32 %v2585_v50, 0.0  ;;  %1706 = vmatpush1.bf16.msra.mxu0 %v2136_v1  ;;  %v544_v55 = vpop.f32.mrb[4].mxu1 }
 0x1bf   :  { %v2595_v57 = vadd.f32 %v544_v55, %v2567_v45  ;;  %v546_v58 = vpop.f32.mrb[5].mxu1  ;;  %1707 = vmatprep.subr.bf16.mxu0 %v1787_v28 }
 0x1c0   :  { %v2599_v46 = vadd.f32 %v546_v58, %v2571_v21  ;;  %970 = vmatprep.mubr.f32.mxu0 %v726_v51 }
 0x1c1   :  { %971 = vmatmul.mubr.f32.gmra.mrb[34].mxu0 %v725_v56  ;;  %v727_v62 = vmax.f32 %v2595_v57, 0.0 }
 0x1c2   :  { %v728_v1 = vmax.f32 %v2599_v46, 0.0  ;;  %v550_v60 = vpop.f32.mrb[6].mxu1  ;;  %1709 = vmatpush1.bf16.msra.mxu0 %v2164_v14 }
 0x1c3   :  { %v2609_v63 = vadd.f32 %v550_v60, %v2567_v45  ;;  %v552_v2 = vpop.f32.mrb[7].mxu1  ;;  %1710 = vmatprep.subr.bf16.mxu0 %v1787_v28 }
 0x1c4   :  { %v2613_v3 = vadd.f32 %v552_v2, %v2571_v21  ;;  %976 = vmatprep.mubr.f32.mxu0 %v728_v1 }
 0x1c5   :  { %977 = vmatmul.mubr.f32.gmra.mrb[36].mxu0 %v727_v62  ;;  %v729_v5 = vmax.f32 %v2609_v63, 0.0 }
 0x1c6   :  { %v730_v41 = vmax.f32 %v2613_v3, 0.0  ;;  %v556_v14 = vpop.f32.mrb[8].mxu1  ;;  %1712 = vmatpush1.bf16.msra.mxu0 %v2183_v26 }
 0x1c7   :  { %v2623_v9 = vadd.f32 %v556_v14, %v2567_v45  ;;  %v558_v10 = vpop.f32.mrb[9].mxu1  ;;  %1713 = vmatprep.subr.bf16.mxu0 %v1787_v28 }
 0x1c8   :  { %v2627_v12 = vadd.f32 %v558_v10, %v2571_v21  ;;  %982 = vmatprep.mubr.f32.mxu0 %v730_v41 }
 0x1c9   :  { %983 = vmatmul.mubr.f32.gmra.mrb[38].mxu0 %v729_v5  ;;  %v731_v11 = vmax.f32 %v2623_v9, 0.0 }
 0x1ca   :  { %v732_v13 = vmax.f32 %v2627_v12, 0.0  ;;  %v562_v26 = vpop.f32.mrb[10].mxu1  ;;  %1715 = vmatpush1.bf16.msra.mxu0 %v2211_v40 }
 0x1cb   :  { %v2637_v16 = vadd.f32 %v562_v26, %v2567_v45  ;;  %v564_v6 = vpop.f32.mrb[11].mxu1  ;;  %1716 = vmatprep.subr.bf16.mxu0 %v1787_v28 }
 0x1cc   :  { %v2641_v18 = vadd.f32 %v564_v6, %v2571_v21  ;;  %988 = vmatprep.mubr.f32.mxu0 %v732_v13 }
 0x1cd   :  { %989 = vmatmul.mubr.f32.gmra.mrb[40].mxu0 %v731_v11  ;;  %v733_v24 = vmax.f32 %v2637_v16, 0.0 }
 0x1ce   :  { %v734_v23 = vmax.f32 %v2641_v18, 0.0  ;;  %v568_v40 = vpop.f32.mrb[12].mxu1  ;;  %1718 = vmatpush1.bf16.msra.mxu0 %v2240_v53 }
 0x1cf   :  { %v2651_v29 = vadd.f32 %v568_v40, %v2567_v45  ;;  %v570_v54 = vpop.f32.mrb[13].mxu1  ;;  %1719 = vmatprep.subr.bf16.mxu0 %v1787_v28 }
 0x1d0   :  { %v2655_v31 = vadd.f32 %v570_v54, %v2571_v21  ;;  %994 = vmatprep.mubr.f32.mxu0 %v734_v23 }
 0x1d1   :  { %995 = vmatmul.mubr.f32.gmra.mrb[42].mxu0 %v733_v24  ;;  %v735_v33 = vmax.f32 %v2651_v29, 0.0 }
 0x1d2   :  { %v736_v32 = vmax.f32 %v2655_v31, 0.0  ;;  %v574_v53 = vpop.f32.mrb[14].mxu1  ;;  %1721 = vmatpush1.bf16.msra.mxu0 %v2438_v52 }
 0x1d3   :  { %v2665_v20 = vadd.f32 %v574_v53, %v2567_v45  ;;  %v576_v35 = vpop.f32.mrb[15].mxu1  ;;  %1722 = vmatprep.subr.bf16.mxu0 %v1787_v28 }
 0x1d4   :  { %v2669_v39 = vadd.f32 %v576_v35, %v2571_v21  ;;  %1000 = vmatprep.mubr.f32.mxu0 %v736_v32 }
 0x1d5   :  { %1001 = vmatmul.mubr.f32.gmra.mrb[44].mxu0 %v735_v33  ;;  %v737_v7 = vmax.f32 %v2665_v20, 0.0 }
 0x1d6   :  { %v738_v44 = vmax.f32 %v2669_v39, 0.0  ;;  %v580_v52 = vpop.f32.mrb[16].mxu1  ;;  %1724 = vmatpush1.bf16.msra.mxu0 %v2451_v59 }
 0x1d7   :  { %v2679_v19 = vadd.f32 %v580_v52, %v2567_v45  ;;  %v582_v37 = vpop.f32.mrb[17].mxu1  ;;  %1725 = vmatprep.subr.bf16.mxu0 %v1787_v28 }
 0x1d8   :  { %v2683_v22 = vadd.f32 %v582_v37, %v2571_v21  ;;  %1006 = vmatprep.mubr.f32.mxu0 %v738_v44 }
 0x1d9   :  { %1007 = vmatmul.mubr.f32.gmra.mrb[46].mxu0 %v737_v7  ;;  %v739_v58 = vmax.f32 %v2679_v19, 0.0 }
 0x1da   :  { %v740_v55 = vmax.f32 %v2683_v22, 0.0  ;;  %v586_v59 = vpop.f32.mrb[18].mxu1  ;;  %1727 = vmatpush1.bf16.msra.mxu0 %v2462_v61 }
 0x1db   :  { %v2693_v60 = vadd.f32 %v586_v59, %v2567_v45  ;;  %v588_v2 = vpop.f32.mrb[19].mxu1  ;;  %1728 = vmatprep.subr.bf16.mxu0 %v1787_v28 }
 0x1dc   :  { %v2697_v14 = vadd.f32 %v588_v2, %v2571_v21  ;;  %1012 = vmatprep.mubr.f32.mxu0 %v740_v55 }
 0x1dd   :  { %1013 = vmatmul.mubr.f32.gmra.mrb[48].mxu0 %v739_v58  ;;  %v741_v26 = vmax.f32 %v2693_v60, 0.0 }
 0x1de   :  { %v742_v10 = vmax.f32 %v2697_v14, 0.0  ;;  %v592_v61 = vpop.f32.mrb[20].mxu1  ;;  %1730 = vmatpush1.bf16.msra.mxu0 %v2475_v4 }
 0x1df   :  { %v2707_v6 = vadd.f32 %v592_v61, %v2567_v45  ;;  %v594_v40 = vpop.f32.mrb[21].mxu1  ;;  %1731 = vmatprep.subr.bf16.mxu0 %v1787_v28 }
 0x1e0   :  { %v2711_v54 = vadd.f32 %v594_v40, %v2571_v21  ;;  %1018 = vmatprep.mubr.f32.mxu0 %v742_v10 }
 0x1e1   :  { %1019 = vmatmul.mubr.f32.gmra.mrb[50].mxu0 %v741_v26  ;;  %v3235_v35 = vmax.f32 %v2707_v6, 0.0 }
 0x1e2   :  { %v744_v53 = vmax.f32 %v2711_v54, 0.0  ;;  %v598_v4 = vpop.f32.mrb[22].mxu1  ;;  %1733 = vmatpush1.bf16.msra.mxu0 %v2486_v8 }
 0x1e3   :  { %v599_v52 = vadd.f32 %v598_v4, %v2567_v45  ;;  %v600_v37 = vpop.f32.mrb[23].mxu1  ;;  %1734 = vmatprep.subr.bf16.mxu0 %v1787_v28 }
 0x1e4   :  { %v601_v59 = vadd.f32 %v600_v37, %v2571_v21  ;;  %1024 = vmatprep.mubr.f32.mxu0 %v744_v53 }
 0x1e5   :  { %1025 = vmatmul.mubr.f32.gmra.mrb[52].mxu0 %v3235_v35  ;;  %v745_v8 = vmax.f32 %v599_v52, 0.0 }
 0x1e6   :  { %v746_v2 = vmax.f32 %v601_v59, 0.0  ;;  %v604_v61 = vpop.f32.mrb[24].mxu1  ;;  %1736 = vmatpush1.bf16.msra.mxu0 %v2499_v36 }
 0x1e7   :  { %v605_v40 = vadd.f32 %v604_v61, %v2567_v45  ;;  %v606_v49 = vpop.f32.mrb[25].mxu1  ;;  %1737 = vmatprep.subr.bf16.mxu0 %v1787_v28 }
 0x1e8   :  { %v607_v4 = vadd.f32 %v606_v49, %v2571_v21  ;;  %1030 = vmatprep.mubr.f32.mxu0 %v746_v2  ;;  %1276 = vmatprep.mubr.f32.mxu1 %v746_v2 }
 0x1e9   :  { %1031 = vmatmul.mubr.f32.gmra.mrb[54].mxu0 %v745_v8  ;;  %1277 = vmatmul.mubr.f32.vlgmr.msra.gmra.mrb[64].mxu1 %v745_v8  ;;  %v747_v59 = vmax.f32 %v605_v40, 0.0 }
 0x1ea   :  { %v748_v37 = vmax.f32 %v607_v4, 0.0  ;;  %v610_v43 = vpop.f32.mrb[26].mxu1  ;;  %1739 = vmatpush1.bf16.msra.mxu0 %v2510_v17 }
 0x1eb   :  { %v611_v35 = vadd.f32 %v610_v43, %v2567_v45  ;;  %v612_v36 = vpop.f32.mrb[27].mxu1  ;;  %1740 = vmatprep.subr.bf16.mxu0 %v1787_v28 }
 0x1ec   :  { %v613_v52 = vadd.f32 %v612_v36, %v2571_v21  ;;  %1036 = vmatprep.mubr.f32.mxu0 %v748_v37  ;;  %1281 = vmatprep.mubr.f32.mxu1 %v748_v37 }
 0x1ed   :  { %1037 = vmatmul.mubr.f32.gmra.mrb[56].mxu0 %v747_v59  ;;  %1282 = vmatmul.mubr.f32.gmra.mrb[66].mxu1 %v747_v59  ;;  %v749_v61 = vmax.f32 %v611_v35, 0.0 }
 0x1ee   :  { %v750_v49 = vmax.f32 %v613_v52, 0.0  ;;  %v616_v2 = vpop.f32.mrb[28].mxu1  ;;  %1742 = vmatpush1.bf16.msra.mxu0 %v2523_v25 }
 0x1ef   :  { %v617_v8 = vadd.f32 %v616_v2, %v2567_v45  ;;  %v618_v17 = vpop.f32.mrb[29].mxu1  ;;  %1743 = vmatprep.subr.bf16.mxu0 %v1787_v28 }
 0x1f0   :  { %v619_v43 = vadd.f32 %v618_v17, %v2571_v21  ;;  %1042 = vmatprep.mubr.f32.mxu0 %v750_v49  ;;  %1286 = vmatprep.mubr.f32.mxu1 %v750_v49 }
 0x1f1   :  { %1043 = vmatmul.mubr.f32.gmra.mrb[58].mxu0 %v749_v61  ;;  %1287 = vmatmul.mubr.f32.gmra.mrb[68].mxu1 %v749_v61  ;;  %v751_v37 = vmax.f32 %v617_v8, 0.0 }
 0x1f2   :  { %v752_v40 = vmax.f32 %v619_v43, 0.0  ;;  %v622_v4 = vpop.f32.mrb[30].mxu1  ;;  %1745 = vmatpush1.bf16.msra.mxu0 %v2534_v30 }
 0x1f3   :  { %v623_v59 = vadd.f32 %v622_v4, %v2567_v45  ;;  %v624_v25 = vpop.f32.mrb[31].mxu1  ;;  %1746 = vmatprep.subr.bf16.mxu0 %v1787_v28 }
 0x1f4   :  { %v625_v35 = vadd.f32 %v624_v25, %v2571_v21  ;;  %1048 = vmatprep.mubr.f32.mxu0 %v752_v40  ;;  %1291 = vmatprep.mubr.f32.mxu1 %v752_v40 }
 0x1f5   :  { %1049 = vmatmul.mubr.f32.gmra.mrb[60].mxu0 %v751_v37  ;;  %1292 = vmatmul.mubr.f32.gmra.mrb[70].mxu1 %v751_v37  ;;  %v753_v49 = vmax.f32 %v623_v59, 0.0 }
 0x1f6   :  { %v754_v36 = vmax.f32 %v625_v35, 0.0  ;;  %v628_v52 = vpop.f32.mrb[32].mxu1  ;;  %1748 = vmatpush1.bf16.msra.mxu0 %v2545_v34 }
 0x1f7   :  { %v629_v2 = vadd.f32 %v628_v52, %v2567_v45  ;;  %v630_v30 = vpop.f32.mrb[33].mxu1  ;;  %1749 = vmatprep.subr.bf16.mxu0 %v1787_v28 }
 0x1f8   :  { %v631_v61 = vadd.f32 %v630_v30, %v2571_v21  ;;  %1054 = vmatprep.mubr.f32.mxu0 %v754_v36  ;;  %1296 = vmatprep.mubr.f32.mxu1 %v754_v36 }
 0x1f9   :  { %1055 = vmatmul.mubr.f32.gmra.mrb[62].mxu0 %v753_v49  ;;  %1297 = vmatmul.mubr.f32.gmra.mrb[72].mxu1 %v753_v49  ;;  %v755_v43 = vmax.f32 %v629_v2, 0.0 }
 0x1fa   :  { %v756_v8 = vmax.f32 %v631_v61, 0.0  ;;  %v634_v17 = vpop.f32.mrb[34].mxu1  ;;  %1751 = vmatpush1.bf16.msra.mxu0 %v2555_v38 }
 0x1fb   :  { %v635_v40 = vadd.f32 %v634_v17, %v2567_v45  ;;  %v636_v34 = vpop.f32.mrb[35].mxu1 }
 0x1fc   :  { %v637_v4 = vadd.f32 %v636_v34, %v2571_v21  ;;  %1060 = vmatprep.mubr.f32.mxu0 %v756_v8  ;;  %1301 = vmatprep.mubr.f32.mxu1 %v756_v8 }
 0x1fd   :  { %1061 = vmatmul.mubr.f32.gmra.mrb[64].mxu0 %v755_v43  ;;  %1302 = vmatmul.mubr.f32.gmra.mrb[74].mxu1 %v755_v43  ;;  %v757_v59 = vmax.f32 %v635_v40, 0.0 }
 0x1fe   :  { %v758_v28 = vmax.f32 %v637_v4, 0.0  ;;  %v640_v37 = vpop.f32.mrb[36].mxu1 }
 0x1ff   :  { %v641_v25 = vadd.f32 %v640_v37, %v2567_v45  ;;  %v642_v35 = vpop.f32.mrb[37].mxu1 }
 0x200   :  { %v643_v36 = vadd.f32 %v642_v35, %v2571_v21  ;;  %1066 = vmatprep.mubr.f32.mxu0 %v758_v28  ;;  %1306 = vmatprep.mubr.f32.mxu1 %v758_v28 }
 0x201   :  { %1067 = vmatmul.mubr.f32.gmra.mrb[66].mxu0 %v757_v59  ;;  %1307 = vmatmul.mubr.f32.gmra.mrb[76].mxu1 %v757_v59  ;;  %v759_v49 = vmax.f32 %v641_v25, 0.0 }
 0x202   :  { %v760_v38 = vmax.f32 %v643_v36, 0.0  ;;  %v646_v52 = vpop.f32.mrb[38].mxu1 }
 0x203   :  { %v647_v2 = vadd.f32 %v646_v52, %v2567_v45  ;;  %v648_v30 = vpop.f32.mrb[39].mxu1 }
 0x204   :  { %v649_v61 = vadd.f32 %v648_v30, %v2571_v21  ;;  %1072 = vmatprep.mubr.f32.mxu0 %v760_v38  ;;  %1311 = vmatprep.mubr.f32.mxu1 %v760_v38 }
 0x205   :  { %1073 = vmatmul.mubr.f32.gmra.mrb[68].mxu0 %v759_v49  ;;  %1312 = vmatmul.mubr.f32.gmra.mrb[78].mxu1 %v759_v49  ;;  %v761_v43 = vmax.f32 %v647_v2, 0.0 }
 0x206   :  { %v762_v8 = vmax.f32 %v649_v61, 0.0  ;;  %v652_v17 = vpop.f32.mrb[40].mxu1 }
 0x207   :  { %v653_v40 = vadd.f32 %v652_v17, %v2567_v45  ;;  %v654_v34 = vpop.f32.mrb[41].mxu1 }
 0x208   :  { %v655_v4 = vadd.f32 %v654_v34, %v2571_v21  ;;  %1078 = vmatprep.mubr.f32.mxu0 %v762_v8  ;;  %1316 = vmatprep.mubr.f32.mxu1 %v762_v8 }
 0x209   :  { %1079 = vmatmul.mubr.f32.gmra.mrb[70].mxu0 %v761_v43  ;;  %1317 = vmatmul.mubr.f32.gmra.mrb[80].mxu1 %v761_v43  ;;  %v763_v59 = vmax.f32 %v653_v40, 0.0 }
 0x20a   :  { %v764_v28 = vmax.f32 %v655_v4, 0.0  ;;  %v658_v37 = vpop.f32.mrb[42].mxu1 }
 0x20b   :  { %v659_v25 = vadd.f32 %v658_v37, %v2567_v45  ;;  %v660_v35 = vpop.f32.mrb[43].mxu1 }
 0x20c   :  { %v661_v36 = vadd.f32 %v660_v35, %v2571_v21  ;;  %1084 = vmatprep.mubr.f32.mxu0 %v764_v28  ;;  %1321 = vmatprep.mubr.f32.mxu1 %v764_v28 }
 0x20d   :  { %1085 = vmatmul.mubr.f32.gmra.mrb[72].mxu0 %v763_v59  ;;  %1322 = vmatmul.mubr.f32.gmra.mrb[82].mxu1 %v763_v59  ;;  %v765_v49 = vmax.f32 %v659_v25, 0.0 }
 0x20e   :  { %v766_v38 = vmax.f32 %v661_v36, 0.0  ;;  %v664_v52 = vpop.f32.mrb[44].mxu1 }
 0x20f   :  { %v665_v2 = vadd.f32 %v664_v52, %v2567_v45  ;;  %v666_v30 = vpop.f32.mrb[45].mxu1 }
 0x210   :  { %v667_v61 = vadd.f32 %v666_v30, %v2571_v21  ;;  %1090 = vmatprep.mubr.f32.mxu0 %v766_v38  ;;  %1326 = vmatprep.mubr.f32.mxu1 %v766_v38 }
 0x211   :  { %1091 = vmatmul.mubr.f32.gmra.mrb[74].mxu0 %v765_v49  ;;  %1327 = vmatmul.mubr.f32.gmra.mrb[84].mxu1 %v765_v49  ;;  %v767_v43 = vmax.f32 %v665_v2, 0.0 }
 0x212   :  { %v768_v8 = vmax.f32 %v667_v61, 0.0  ;;  %v670_v17 = vpop.f32.mrb[46].mxu1 }
 0x213   :  { %v671_v40 = vadd.f32 %v670_v17, %v2567_v45  ;;  %v672_v34 = vpop.f32.mrb[47].mxu1 }
 0x214   :  { %v673_v4 = vadd.f32 %v672_v34, %v2571_v21  ;;  %1096 = vmatprep.mubr.f32.mxu0 %v768_v8  ;;  %1331 = vmatprep.mubr.f32.mxu1 %v768_v8 }
 0x215   :  { %1097 = vmatmul.mubr.f32.gmra.mrb[76].mxu0 %v767_v43  ;;  %1332 = vmatmul.mubr.f32.gmra.mrb[86].mxu1 %v767_v43  ;;  %v769_v59 = vmax.f32 %v671_v40, 0.0 }
 0x216   :  { %v770_v28 = vmax.f32 %v673_v4, 0.0  ;;  %v676_v37 = vpop.f32.mrb[48].mxu1 }
 0x217   :  { %v677_v25 = vadd.f32 %v676_v37, %v2567_v45  ;;  %v678_v35 = vpop.f32.mrb[49].mxu1 }
 0x218   :  { %v679_v36 = vadd.f32 %v678_v35, %v2571_v21  ;;  %1102 = vmatprep.mubr.f32.mxu0 %v770_v28  ;;  %1336 = vmatprep.mubr.f32.mxu1 %v770_v28 }
 0x219   :  { %1103 = vmatmul.mubr.f32.gmra.mrb[78].mxu0 %v769_v59  ;;  %1337 = vmatmul.mubr.f32.gmra.mrb[88].mxu1 %v769_v59  ;;  %v771_v49 = vmax.f32 %v677_v25, 0.0 }
 0x21a   :  { %v772_v38 = vmax.f32 %v679_v36, 0.0  ;;  %v682_v52 = vpop.f32.mrb[50].mxu1 }
 0x21b   :  { %v683_v2 = vadd.f32 %v682_v52, %v2567_v45  ;;  %v684_v30 = vpop.f32.mrb[51].mxu1 }
 0x21c   :  { %v685_v61 = vadd.f32 %v684_v30, %v2571_v21  ;;  %1108 = vmatprep.mubr.f32.mxu0 %v772_v38  ;;  %1341 = vmatprep.mubr.f32.mxu1 %v772_v38 }
 0x21d   :  { %1109 = vmatmul.mubr.f32.gmra.mrb[80].mxu0 %v771_v49  ;;  %1342 = vmatmul.mubr.f32.gmra.mrb[90].mxu1 %v771_v49  ;;  %v773_v43 = vmax.f32 %v683_v2, 0.0 }
 0x21e   :  { %v774_v8 = vmax.f32 %v685_v61, 0.0  ;;  %v688_v17 = vpop.f32.mrb[52].mxu1 }
 0x21f   :  { %v689_v40 = vadd.f32 %v688_v17, %v2567_v45  ;;  %v690_v34 = vpop.f32.mrb[53].mxu1 }
 0x220   :  { %v691_v4 = vadd.f32 %v690_v34, %v2571_v21  ;;  %1114 = vmatprep.mubr.f32.mxu0 %v774_v8  ;;  %1346 = vmatprep.mubr.f32.mxu1 %v774_v8 }
 0x221   :  { %1115 = vmatmul.mubr.f32.gmra.mrb[82].mxu0 %v773_v43  ;;  %1347 = vmatmul.mubr.f32.gmra.mrb[92].mxu1 %v773_v43  ;;  %v775_v59 = vmax.f32 %v689_v40, 0.0 }
 0x222   :  { %v776_v28 = vmax.f32 %v691_v4, 0.0  ;;  %v694_v37 = vpop.f32.mrb[54].mxu1 }
 0x223   :  { %v695_v25 = vadd.f32 %v694_v37, %v2567_v45  ;;  %v696_v35 = vpop.f32.mrb[55].mxu1 }
 0x224   :  { %v697_v36 = vadd.f32 %v696_v35, %v2571_v21  ;;  %1120 = vmatprep.mubr.f32.mxu0 %v776_v28  ;;  %1351 = vmatprep.mubr.f32.mxu1 %v776_v28 }
 0x225   :  { %1121 = vmatmul.mubr.f32.gmra.mrb[84].mxu0 %v775_v59  ;;  %1352 = vmatmul.mubr.f32.gmra.mrb[94].mxu1 %v775_v59  ;;  %v777_v49 = vmax.f32 %v695_v25, 0.0 }
 0x226   :  { %v778_v38 = vmax.f32 %v697_v36, 0.0  ;;  %v700_v52 = vpop.f32.mrb[56].mxu1 }
 0x227   :  { %v701_v2 = vadd.f32 %v700_v52, %v2567_v45  ;;  %v702_v30 = vpop.f32.mrb[57].mxu1 }
 0x228   :  { %v703_v61 = vadd.f32 %v702_v30, %v2571_v21  ;;  %1126 = vmatprep.mubr.f32.mxu0 %v778_v38  ;;  %1356 = vmatprep.mubr.f32.mxu1 %v778_v38 }
 0x229   :  { %1127 = vmatmul.mubr.f32.gmra.mrb[86].mxu0 %v777_v49  ;;  %1357 = vmatmul.mubr.f32.gmra.mrb[96].mxu1 %v777_v49  ;;  %v779_v43 = vmax.f32 %v701_v2, 0.0 }
 0x22a   :  { %v780_v8 = vmax.f32 %v703_v61, 0.0  ;;  %v706_v17 = vpop.f32.mrb[58].mxu1 }
 0x22b   :  { %v707_v40 = vadd.f32 %v706_v17, %v2567_v45  ;;  %v708_v34 = vpop.f32.mrb[59].mxu1 }
 0x22c   :  { %v709_v4 = vadd.f32 %v708_v34, %v2571_v21  ;;  %1132 = vmatprep.mubr.f32.mxu0 %v780_v8  ;;  %1361 = vmatprep.mubr.f32.mxu1 %v780_v8 }
 0x22d   :  { %1133 = vmatmul.mubr.f32.gmra.mrb[88].mxu0 %v779_v43  ;;  %1362 = vmatmul.mubr.f32.gmra.mrb[98].mxu1 %v779_v43  ;;  %v781_v59 = vmax.f32 %v707_v40, 0.0  ;;  %v895_v43 = vsub.s32 2, %v2558_v42 }
 0x22e   :  { %v782_v28 = vmax.f32 %v709_v4, 0.0  ;;  %v712_v37 = vpop.f32.mrb[60].mxu1 }
 0x22f   :  { %v713_v25 = vadd.f32 %v712_v37, %v2567_v45  ;;  %v714_v35 = vpop.f32.mrb[61].mxu1 }
 0x230   :  { %v715_v36 = vadd.f32 %v714_v35, %v2571_v21  ;;  %1138 = vmatprep.mubr.f32.mxu0 %v782_v28  ;;  %1366 = vmatprep.mubr.f32.mxu1 %v782_v28 }
 0x231   :  { %1139 = vmatmul.mubr.f32.gmra.mrb[90].mxu0 %v781_v59  ;;  %1367 = vmatmul.mubr.f32.gmra.mrb[100].mxu1 %v781_v59  ;;  %v783_v49 = vmax.f32 %v713_v25, 0.0 }
 0x232   :  { %v784_v38 = vmax.f32 %v715_v36, 0.0  ;;  %v718_v52 = vpop.f32.mrb[62].mxu1 }
 0x233   :  { %v719_v2 = vadd.f32 %v718_v52, %v2567_v45  ;;  %v720_v30 = vpop.f32.mrb[63].mxu1  ;;  %v3236_v45 = vmax.f32 %v2707_v6, 0.0 }
 0x234   :  { %v721_v61 = vadd.f32 %v720_v30, %v2571_v21  ;;  %1144 = vmatprep.mubr.f32.mxu0 %v784_v38  ;;  %1371 = vmatprep.mubr.f32.mxu1 %v784_v38  ;;  %v2825_v21 = vld [vmem:[%s3231_s6] sm:$0x7] }
 0x235   :  { %1145 = vmatmul.mubr.f32.gmra.mrb[92].mxu0 %v783_v49  ;;  %1372 = vmatmul.mubr.f32.gmra.mrb[102].mxu1 %v783_v49  ;;  %v785_v17 = vmax.f32 %v719_v2, 0.0  ;;  %v2830_v47 = vrot.slane %v2825_v21, %v3237_v0  ;;  %v2920_v37 = vrot.slane %v2825_v21, %v895_v43 }
 0x236   :  { %v786_v8 = vmax.f32 %v721_v61, 0.0 }
 0x238   :  { %1150 = vmatprep.mubr.f32.mxu0 %v786_v8  ;;  %1376 = vmatprep.mubr.f32.mxu1 %v786_v8 }
 0x239   :  { %1151 = vmatmul.mubr.f32.gmra.mrb[94].mxu0 %v785_v17  ;;  %1377 = vmatmul.mubr.f32.gmra.mrb[104].mxu1 %v785_v17 }
 0x23a   :  { %1221 = vmatprep.mubr.f32.mxu0 %v724_v15  ;;  %v3238_v15 = vsub.s32 1, %v2558_v42 }
 0x23d   :  { %1222 = vmatmul.mubr.f32.vlgmr.msra.gmra.mrb[96].mxu0 %v723_v48  ;;  %v2835_v48 = vrot.slane %v2825_v21, %v3238_v15 }
 0x23e   :  { %1226 = vmatprep.mubr.f32.mxu0 %v726_v51 }
 0x241   :  { %1227 = vmatmul.mubr.f32.gmra.mrb[98].mxu0 %v725_v56 }
 0x242   :  { %1231 = vmatprep.mubr.f32.mxu0 %v728_v1 }
 0x245   :  { %1232 = vmatmul.mubr.f32.gmra.mrb[100].mxu0 %v727_v62 }
 0x246   :  { %1236 = vmatprep.mubr.f32.mxu0 %v730_v41 }
 0x249   :  { %1237 = vmatmul.mubr.f32.gmra.mrb[102].mxu0 %v729_v5 }
 0x24a   :  { %1241 = vmatprep.mubr.f32.mxu0 %v732_v13 }
 0x24d   :  { %1242 = vmatmul.mubr.f32.gmra.mrb[104].mxu0 %v731_v11 }
 0x24e   :  { %1246 = vmatprep.mubr.f32.mxu0 %v734_v23 }
 0x251   :  { %1247 = vmatmul.mubr.f32.gmra.mrb[106].mxu0 %v733_v24 }
 0x252   :  { %1251 = vmatprep.mubr.f32.mxu0 %v736_v32 }
 0x255   :  { %1252 = vmatmul.mubr.f32.gmra.mrb[108].mxu0 %v735_v33 }
 0x256   :  { %1256 = vmatprep.mubr.f32.mxu0 %v738_v44 }
 0x259   :  { %1257 = vmatmul.mubr.f32.gmra.mrb[110].mxu0 %v737_v7 }
 0x25a   :  { %1261 = vmatprep.mubr.f32.mxu0 %v740_v55 }
 0x25d   :  { %1262 = vmatmul.mubr.f32.gmra.mrb[112].mxu0 %v739_v58 }
 0x25e   :  { %1266 = vmatprep.mubr.f32.mxu0 %v742_v10 }
 0x261   :  { %1267 = vmatmul.mubr.f32.gmra.mrb[114].mxu0 %v741_v26 }
 0x262   :  { %1271 = vmatprep.mubr.f32.mxu0 %v744_v53 }
 0x265   :  { %1272 = vmatmul.mubr.f32.gmra.mrb[116].mxu0 %v3236_v45 }
 0x290   :  { %v966_v27 = vpop.f32.mrb[32].mxu0 }
 0x291   :  { %v967_v50 = vadd.f32 %v966_v27, %v2830_v47  ;;  %v968_v51 = vpop.f32.mrb[33].mxu0 }
 0x292   :  { %v969_v56 = vadd.f32 %v968_v51, %v2835_v48 }
 0x293   :  { %1382 = vst [vmem:[%s3232_s7] sm:$0xff] %v967_v50 }
 0x294   :  { %1383 = vst [vmem:[%s3232_s7 + $0x8] sm:$0xff] %v969_v56  ;;  %v972_v57 = vpop.f32.mrb[34].mxu0 }
 0x295   :  { %v973_v46 = vadd.f32 %v972_v57, %v2830_v47  ;;  %v974_v1 = vpop.f32.mrb[35].mxu0 }
 0x296   :  { %v975_v62 = vadd.f32 %v974_v1, %v2835_v48 }
 0x297   :  { %1385 = vst [vmem:[%s3232_s7 + $0x18] sm:$0xff] %v973_v46 }
 0x298   :  { %1386 = vst [vmem:[%s3232_s7 + $0x20] sm:$0xff] %v975_v62  ;;  %v978_v63 = vpop.f32.mrb[36].mxu0 }
 0x299   :  { %v979_v3 = vadd.f32 %v978_v63, %v2830_v47  ;;  %v980_v41 = vpop.f32.mrb[37].mxu0 }
 0x29a   :  { %v981_v5 = vadd.f32 %v980_v41, %v2835_v48 }
 0x29b   :  { %1388 = vst [vmem:[%s3232_s7 + $0x30] sm:$0xff] %v979_v3 }
 0x29c   :  { %1389 = vst [vmem:[%s3232_s7 + $0x38] sm:$0xff] %v981_v5  ;;  %v984_v9 = vpop.f32.mrb[38].mxu0 }
 0x29d   :  { %v985_v12 = vadd.f32 %v984_v9, %v2830_v47  ;;  %v986_v13 = vpop.f32.mrb[39].mxu0 }
 0x29e   :  { %v987_v11 = vadd.f32 %v986_v13, %v2835_v48 }
 0x29f   :  { %1391 = vst [vmem:[%s3232_s7 + $0x48] sm:$0xff] %v985_v12 }
 0x2a0   :  { %1392 = vst [vmem:[%s3232_s7 + $0x50] sm:$0xff] %v987_v11  ;;  %v990_v16 = vpop.f32.mrb[40].mxu0 }
 0x2a1   :  { %v991_v18 = vadd.f32 %v990_v16, %v2830_v47  ;;  %v992_v23 = vpop.f32.mrb[41].mxu0 }
 0x2a2   :  { %v993_v24 = vadd.f32 %v992_v23, %v2835_v48 }
 0x2a3   :  { %1394 = vst [vmem:[%s3232_s7 + $0x60] sm:$0xff] %v991_v18 }
 0x2a4   :  { %1395 = vst [vmem:[%s3232_s7 + $0x68] sm:$0xff] %v993_v24  ;;  %v996_v29 = vpop.f32.mrb[42].mxu0 }
 0x2a5   :  { %v997_v31 = vadd.f32 %v996_v29, %v2830_v47  ;;  %v998_v32 = vpop.f32.mrb[43].mxu0 }
 0x2a6   :  { %v999_v33 = vadd.f32 %v998_v32, %v2835_v48 }
 0x2a7   :  { %1397 = vst [vmem:[%s3232_s7 + $0x78] sm:$0xff] %v997_v31 }
 0x2a8   :  { %1398 = vst [vmem:[%s3232_s7 + $0x80] sm:$0xff] %v999_v33  ;;  %v1002_v20 = vpop.f32.mrb[44].mxu0 }
 0x2a9   :  { %v1003_v39 = vadd.f32 %v1002_v20, %v2830_v47  ;;  %v1004_v44 = vpop.f32.mrb[45].mxu0 }
 0x2aa   :  { %v1005_v7 = vadd.f32 %v1004_v44, %v2835_v48 }
 0x2ab   :  { %1400 = vst [vmem:[%s3232_s7 + $0x90] sm:$0xff] %v1003_v39 }
 0x2ac   :  { %1401 = vst [vmem:[%s3232_s7 + $0x98] sm:$0xff] %v1005_v7  ;;  %v1008_v19 = vpop.f32.mrb[46].mxu0 }
 0x2ad   :  { %v1009_v22 = vadd.f32 %v1008_v19, %v2830_v47  ;;  %v1010_v55 = vpop.f32.mrb[47].mxu0 }
 0x2ae   :  { %v1011_v58 = vadd.f32 %v1010_v55, %v2835_v48 }
 0x2af   :  { %1403 = vst [vmem:[%s3232_s7 + $0xa8] sm:$0xff] %v1009_v22 }
 0x2b0   :  { %1404 = vst [vmem:[%s3232_s7 + $0xb0] sm:$0xff] %v1011_v58  ;;  %v1014_v60 = vpop.f32.mrb[48].mxu0 }
 0x2b1   :  { %v1015_v14 = vadd.f32 %v1014_v60, %v2830_v47  ;;  %v1016_v10 = vpop.f32.mrb[49].mxu0 }
 0x2b2   :  { %v1017_v26 = vadd.f32 %v1016_v10, %v2835_v48 }
 0x2b3   :  { %1406 = vst [vmem:[%s3232_s7 + $0xc0] sm:$0xff] %v1015_v14 }
 0x2b4   :  { %1407 = vst [vmem:[%s3232_s7 + $0xc8] sm:$0xff] %v1017_v26  ;;  %v1020_v6 = vpop.f32.mrb[50].mxu0 }
 0x2b5   :  { %v1021_v54 = vadd.f32 %v1020_v6, %v2830_v47  ;;  %v1022_v53 = vpop.f32.mrb[51].mxu0 }
 0x2b6   :  { %v1023_v40 = vadd.f32 %v1022_v53, %v2835_v48 }
 0x2b7   :  { %1409 = vst [vmem:[%s3232_s7 + $0xd8] sm:$0xff] %v1021_v54 }
 0x2b8   :  { %1410 = vst [vmem:[%s3232_s7 + $0xe0] sm:$0xff] %v1023_v40  ;;  %v1026_v34 = vpop.f32.mrb[52].mxu0 }
 0x2b9   :  { %v1027_v4 = vadd.f32 %v1026_v34, %v2830_v47  ;;  %v1028_v28 = vpop.f32.mrb[53].mxu0 }
 0x2ba   :  { %v1029_v59 = vadd.f32 %v1028_v28, %v2835_v48 }
 0x2bb   :  { %1412 = vst [vmem:[%s3232_s7 + $0xf0] sm:$0xff] %v1027_v4 }
 0x2bc   :  { %1413 = vst [vmem:[%s3232_s7 + $0xf8] sm:$0xff] %v1029_v59  ;;  %v1032_v42 = vpop.f32.mrb[54].mxu0  ;;  %v1278_v25 = vpop.f32.mrb[64].mxu1 }
 0x2bd   :  { %v1033_v35 = vadd.f32 %v1032_v42, %v2830_v47  ;;  %v1279_v36 = vadd.f32 %v1278_v25, %v2920_v37  ;;  %v1034_v38 = vpop.f32.mrb[55].mxu0  ;;  %v1280_v52 = vpop.f32.mrb[65].mxu1 }
 0x2be   :  { %v1035_v49 = vadd.f32 %v1034_v38, %v2835_v48 }
 0x2bf   :  { %1415 = vst [vmem:[%s3232_s7 + $0x108] sm:$0xff] %v1033_v35  ;;  %1417 = vst [vmem:[%s3232_s7 + $0x118] sm:$0xff] %v1279_v36 }
 0x2c0   :  { %1416 = vst [vmem:[%s3232_s7 + $0x110] sm:$0xff] %v1035_v49  ;;  %v1038_v2 = vpop.f32.mrb[56].mxu0  ;;  %v1283_v30 = vpop.f32.mrb[66].mxu1 }
 0x2c1   :  { %v1039_v61 = vadd.f32 %v1038_v2, %v2830_v47  ;;  %v1284_v8 = vadd.f32 %v1283_v30, %v2920_v37  ;;  %v1040_v17 = vpop.f32.mrb[57].mxu0  ;;  %v1285_v45 = vpop.f32.mrb[67].mxu1 }
 0x2c2   :  { %v1041_v21 = vadd.f32 %v1040_v17, %v2835_v48 }
 0x2c3   :  { %1418 = vst [vmem:[%s3232_s7 + $0x120] sm:$0xff] %v1039_v61  ;;  %1420 = vst [vmem:[%s3232_s7 + $0x130] sm:$0xff] %v1284_v8 }
 0x2c4   :  { %1419 = vst [vmem:[%s3232_s7 + $0x128] sm:$0xff] %v1041_v21  ;;  %v1044_v0 = vpop.f32.mrb[58].mxu0  ;;  %v1288_v15 = vpop.f32.mrb[68].mxu1 }
 0x2c5   :  { %v1045_v27 = vadd.f32 %v1044_v0, %v2830_v47  ;;  %v1289_v50 = vadd.f32 %v1288_v15, %v2920_v37  ;;  %v1046_v51 = vpop.f32.mrb[59].mxu0  ;;  %v1290_v56 = vpop.f32.mrb[69].mxu1 }
 0x2c6   :  { %v1047_v57 = vadd.f32 %v1046_v51, %v2835_v48 }
 0x2c7   :  { %1421 = vst [vmem:[%s3232_s7 + $0x138] sm:$0xff] %v1045_v27  ;;  %1423 = vst [vmem:[%s3232_s7 + $0x148] sm:$0xff] %v1289_v50 }
 0x2c8   :  { %1422 = vst [vmem:[%s3232_s7 + $0x140] sm:$0xff] %v1047_v57  ;;  %v1050_v46 = vpop.f32.mrb[60].mxu0  ;;  %v1293_v1 = vpop.f32.mrb[70].mxu1 }
 0x2c9   :  { %v1051_v62 = vadd.f32 %v1050_v46, %v2830_v47  ;;  %v1294_v63 = vadd.f32 %v1293_v1, %v2920_v37  ;;  %v1052_v3 = vpop.f32.mrb[61].mxu0  ;;  %v1295_v41 = vpop.f32.mrb[71].mxu1 }
 0x2ca   :  { %v1053_v5 = vadd.f32 %v1052_v3, %v2835_v48 }
 0x2cb   :  { %1424 = vst [vmem:[%s3232_s7 + $0x150] sm:$0xff] %v1051_v62  ;;  %1426 = vst [vmem:[%s3232_s7 + $0x160] sm:$0xff] %v1294_v63 }
 0x2cc   :  { %1425 = vst [vmem:[%s3232_s7 + $0x158] sm:$0xff] %v1053_v5  ;;  %v1056_v9 = vpop.f32.mrb[62].mxu0  ;;  %v1298_v12 = vpop.f32.mrb[72].mxu1 }
 0x2cd   :  { %v1057_v13 = vadd.f32 %v1056_v9, %v2830_v47  ;;  %v1299_v11 = vadd.f32 %v1298_v12, %v2920_v37  ;;  %v1058_v16 = vpop.f32.mrb[63].mxu0  ;;  %v1300_v18 = vpop.f32.mrb[73].mxu1 }
 0x2ce   :  { %v1059_v23 = vadd.f32 %v1058_v16, %v2835_v48 }
 0x2cf   :  { %1427 = vst [vmem:[%s3232_s7 + $0x168] sm:$0xff] %v1057_v13  ;;  %1429 = vst [vmem:[%s3232_s7 + $0x178] sm:$0xff] %v1299_v11 }
 0x2d0   :  { %1428 = vst [vmem:[%s3232_s7 + $0x170] sm:$0xff] %v1059_v23  ;;  %v1062_v24 = vpop.f32.mrb[64].mxu0  ;;  %v1303_v29 = vpop.f32.mrb[74].mxu1 }
 0x2d1   :  { %v1063_v31 = vadd.f32 %v1062_v24, %v2830_v47  ;;  %v1304_v32 = vadd.f32 %v1303_v29, %v2920_v37  ;;  %v1064_v33 = vpop.f32.mrb[65].mxu0  ;;  %v1305_v20 = vpop.f32.mrb[75].mxu1 }
 0x2d2   :  { %v1065_v39 = vadd.f32 %v1064_v33, %v2835_v48 }
 0x2d3   :  { %1430 = vst [vmem:[%s3232_s7 + $0x180] sm:$0xff] %v1063_v31  ;;  %1432 = vst [vmem:[%s3232_s7 + $0x190] sm:$0xff] %v1304_v32 }
 0x2d4   :  { %1431 = vst [vmem:[%s3232_s7 + $0x188] sm:$0xff] %v1065_v39  ;;  %v1068_v44 = vpop.f32.mrb[66].mxu0  ;;  %v1308_v7 = vpop.f32.mrb[76].mxu1 }
 0x2d5   :  { %v1069_v19 = vadd.f32 %v1068_v44, %v2830_v47  ;;  %v1309_v22 = vadd.f32 %v1308_v7, %v2920_v37  ;;  %v1070_v55 = vpop.f32.mrb[67].mxu0  ;;  %v1310_v58 = vpop.f32.mrb[77].mxu1 }
 0x2d6   :  { %v1071_v60 = vadd.f32 %v1070_v55, %v2835_v48 }
 0x2d7   :  { %1433 = vst [vmem:[%s3232_s7 + $0x198] sm:$0xff] %v1069_v19  ;;  %1435 = vst [vmem:[%s3232_s7 + $0x1a8] sm:$0xff] %v1309_v22 }
 0x2d8   :  { %1434 = vst [vmem:[%s3232_s7 + $0x1a0] sm:$0xff] %v1071_v60  ;;  %v1074_v14 = vpop.f32.mrb[68].mxu0  ;;  %v1313_v10 = vpop.f32.mrb[78].mxu1 }
 0x2d9   :  { %v1075_v26 = vadd.f32 %v1074_v14, %v2830_v47  ;;  %v1314_v6 = vadd.f32 %v1313_v10, %v2920_v37  ;;  %v1076_v54 = vpop.f32.mrb[69].mxu0  ;;  %v1315_v53 = vpop.f32.mrb[79].mxu1 }
 0x2da   :  { %v1077_v43 = vadd.f32 %v1076_v54, %v2835_v48 }
 0x2db   :  { %1436 = vst [vmem:[%s3232_s7 + $0x1b0] sm:$0xff] %v1075_v26  ;;  %1438 = vst [vmem:[%s3232_s7 + $0x1c0] sm:$0xff] %v1314_v6 }
 0x2dc   :  { %1437 = vst [vmem:[%s3232_s7 + $0x1b8] sm:$0xff] %v1077_v43  ;;  %v1080_v40 = vpop.f32.mrb[70].mxu0  ;;  %v1318_v34 = vpop.f32.mrb[80].mxu1 }
 0x2dd   :  { %v1081_v4 = vadd.f32 %v1080_v40, %v2830_v47  ;;  %v1319_v28 = vadd.f32 %v1318_v34, %v2920_v37  ;;  %v1082_v59 = vpop.f32.mrb[71].mxu0  ;;  %v1320_v42 = vpop.f32.mrb[81].mxu1 }
 0x2de   :  { %v1083_v25 = vadd.f32 %v1082_v59, %v2835_v48 }
 0x2df   :  { %1439 = vst [vmem:[%s3232_s7 + $0x1c8] sm:$0xff] %v1081_v4  ;;  %1441 = vst [vmem:[%s3232_s7 + $0x1d8] sm:$0xff] %v1319_v28 }
 0x2e0   :  { %1440 = vst [vmem:[%s3232_s7 + $0x1d0] sm:$0xff] %v1083_v25  ;;  %v1086_v35 = vpop.f32.mrb[72].mxu0  ;;  %v1323_v36 = vpop.f32.mrb[82].mxu1 }
 0x2e1   :  { %v1087_v38 = vadd.f32 %v1086_v35, %v2830_v47  ;;  %v1324_v52 = vadd.f32 %v1323_v36, %v2920_v37  ;;  %v1088_v49 = vpop.f32.mrb[73].mxu0  ;;  %v1325_v2 = vpop.f32.mrb[83].mxu1 }
 0x2e2   :  { %v1089_v30 = vadd.f32 %v1088_v49, %v2835_v48 }
 0x2e3   :  { %1442 = vst [vmem:[%s3232_s7 + $0x1e0] sm:$0xff] %v1087_v38  ;;  %1444 = vst [vmem:[%s3232_s7 + $0x1f0] sm:$0xff] %v1324_v52 }
 0x2e4   :  { %1443 = vst [vmem:[%s3232_s7 + $0x1e8] sm:$0xff] %v1089_v30  ;;  %v1092_v61 = vpop.f32.mrb[74].mxu0  ;;  %v1328_v8 = vpop.f32.mrb[84].mxu1 }
 0x2e5   :  { %v1093_v17 = vadd.f32 %v1092_v61, %v2830_v47  ;;  %v1329_v45 = vadd.f32 %v1328_v8, %v2920_v37  ;;  %v1094_v21 = vpop.f32.mrb[75].mxu0  ;;  %v1330_v0 = vpop.f32.mrb[85].mxu1 }
 0x2e6   :  { %v1095_v15 = vadd.f32 %v1094_v21, %v2835_v48 }
 0x2e7   :  { %1445 = vst [vmem:[%s3232_s7 + $0x1f8] sm:$0xff] %v1093_v17  ;;  %1447 = vst [vmem:[%s3232_s7 + $0x208] sm:$0xff] %v1329_v45 }
 0x2e8   :  { %1446 = vst [vmem:[%s3232_s7 + $0x200] sm:$0xff] %v1095_v15  ;;  %v1098_v27 = vpop.f32.mrb[76].mxu0  ;;  %v1333_v50 = vpop.f32.mrb[86].mxu1 }
 0x2e9   :  { %v1099_v51 = vadd.f32 %v1098_v27, %v2830_v47  ;;  %v1334_v56 = vadd.f32 %v1333_v50, %v2920_v37  ;;  %v1100_v57 = vpop.f32.mrb[77].mxu0  ;;  %v1335_v46 = vpop.f32.mrb[87].mxu1 }
 0x2ea   :  { %v1101_v1 = vadd.f32 %v1100_v57, %v2835_v48 }
 0x2eb   :  { %1448 = vst [vmem:[%s3232_s7 + $0x210] sm:$0xff] %v1099_v51  ;;  %1450 = vst [vmem:[%s3232_s7 + $0x220] sm:$0xff] %v1334_v56 }
 0x2ec   :  { %1449 = vst [vmem:[%s3232_s7 + $0x218] sm:$0xff] %v1101_v1  ;;  %v1104_v62 = vpop.f32.mrb[78].mxu0  ;;  %v1338_v63 = vpop.f32.mrb[88].mxu1 }
 0x2ed   :  { %v1105_v3 = vadd.f32 %v1104_v62, %v2830_v47  ;;  %v1339_v41 = vadd.f32 %v1338_v63, %v2920_v37  ;;  %v1106_v5 = vpop.f32.mrb[79].mxu0  ;;  %v1340_v9 = vpop.f32.mrb[89].mxu1 }
 0x2ee   :  { %v1107_v12 = vadd.f32 %v1106_v5, %v2835_v48 }
 0x2ef   :  { %1451 = vst [vmem:[%s3232_s7 + $0x228] sm:$0xff] %v1105_v3  ;;  %1453 = vst [vmem:[%s3232_s7 + $0x238] sm:$0xff] %v1339_v41 }
 0x2f0   :  { %1452 = vst [vmem:[%s3232_s7 + $0x230] sm:$0xff] %v1107_v12  ;;  %v1110_v13 = vpop.f32.mrb[80].mxu0  ;;  %v1343_v11 = vpop.f32.mrb[90].mxu1 }
 0x2f1   :  { %v1111_v16 = vadd.f32 %v1110_v13, %v2830_v47  ;;  %v1344_v18 = vadd.f32 %v1343_v11, %v2920_v37  ;;  %v1112_v23 = vpop.f32.mrb[81].mxu0  ;;  %v1345_v24 = vpop.f32.mrb[91].mxu1 }
 0x2f2   :  { %v1113_v29 = vadd.f32 %v1112_v23, %v2835_v48 }
 0x2f3   :  { %1454 = vst [vmem:[%s3232_s7 + $0x240] sm:$0xff] %v1111_v16  ;;  %1456 = vst [vmem:[%s3232_s7 + $0x250] sm:$0xff] %v1344_v18 }
 0x2f4   :  { %1455 = vst [vmem:[%s3232_s7 + $0x248] sm:$0xff] %v1113_v29  ;;  %v1116_v31 = vpop.f32.mrb[82].mxu0  ;;  %v1348_v32 = vpop.f32.mrb[92].mxu1 }
 0x2f5   :  { %v1117_v33 = vadd.f32 %v1116_v31, %v2830_v47  ;;  %v1349_v20 = vadd.f32 %v1348_v32, %v2920_v37  ;;  %v1118_v39 = vpop.f32.mrb[83].mxu0  ;;  %v1350_v44 = vpop.f32.mrb[93].mxu1 }
 0x2f6   :  { %v1119_v7 = vadd.f32 %v1118_v39, %v2835_v48 }
 0x2f7   :  { %1457 = vst [vmem:[%s3232_s7 + $0x258] sm:$0xff] %v1117_v33  ;;  %1459 = vst [vmem:[%s3232_s7 + $0x268] sm:$0xff] %v1349_v20 }
 0x2f8   :  { %1458 = vst [vmem:[%s3232_s7 + $0x260] sm:$0xff] %v1119_v7  ;;  %v1122_v19 = vpop.f32.mrb[84].mxu0  ;;  %v1353_v22 = vpop.f32.mrb[94].mxu1 }
 0x2f9   :  { %v1123_v55 = vadd.f32 %v1122_v19, %v2830_v47  ;;  %v1354_v58 = vadd.f32 %v1353_v22, %v2920_v37  ;;  %v1124_v60 = vpop.f32.mrb[85].mxu0  ;;  %v1355_v14 = vpop.f32.mrb[95].mxu1 }
 0x2fa   :  { %v1125_v10 = vadd.f32 %v1124_v60, %v2835_v48 }
 0x2fb   :  { %1460 = vst [vmem:[%s3232_s7 + $0x270] sm:$0xff] %v1123_v55  ;;  %1462 = vst [vmem:[%s3232_s7 + $0x280] sm:$0xff] %v1354_v58 }
 0x2fc   :  { %1461 = vst [vmem:[%s3232_s7 + $0x278] sm:$0xff] %v1125_v10  ;;  %v1128_v26 = vpop.f32.mrb[86].mxu0  ;;  %v1358_v6 = vpop.f32.mrb[96].mxu1 }
 0x2fd   :  { %v1129_v54 = vadd.f32 %v1128_v26, %v2830_v47  ;;  %v1359_v53 = vadd.f32 %v1358_v6, %v2920_v37  ;;  %v1130_v43 = vpop.f32.mrb[87].mxu0  ;;  %v1360_v40 = vpop.f32.mrb[97].mxu1 }
 0x2fe   :  { %v1131_v34 = vadd.f32 %v1130_v43, %v2835_v48 }
 0x2ff   :  { %1463 = vst [vmem:[%s3232_s7 + $0x288] sm:$0xff] %v1129_v54  ;;  %1465 = vst [vmem:[%s3232_s7 + $0x298] sm:$0xff] %v1359_v53 }
 0x300   :  { %1464 = vst [vmem:[%s3232_s7 + $0x290] sm:$0xff] %v1131_v34  ;;  %v1134_v4 = vpop.f32.mrb[88].mxu0  ;;  %v1363_v28 = vpop.f32.mrb[98].mxu1 }
 0x301   :  { %v1135_v59 = vadd.f32 %v1134_v4, %v2830_v47  ;;  %v1364_v42 = vadd.f32 %v1363_v28, %v2920_v37  ;;  %v1136_v25 = vpop.f32.mrb[89].mxu0  ;;  %v1365_v35 = vpop.f32.mrb[99].mxu1 }
 0x302   :  { %v1137_v36 = vadd.f32 %v1136_v25, %v2835_v48 }
 0x303   :  { %1466 = vst [vmem:[%s3232_s7 + $0x2a0] sm:$0xff] %v1135_v59  ;;  %1468 = vst [vmem:[%s3232_s7 + $0x2b0] sm:$0xff] %v1364_v42 }
 0x304   :  { %1467 = vst [vmem:[%s3232_s7 + $0x2a8] sm:$0xff] %v1137_v36  ;;  %v1140_v38 = vpop.f32.mrb[90].mxu0  ;;  %v1368_v52 = vpop.f32.mrb[100].mxu1 }
 0x305   :  { %v1141_v49 = vadd.f32 %v1140_v38, %v2830_v47  ;;  %v1369_v2 = vadd.f32 %v1368_v52, %v2920_v37  ;;  %v1142_v30 = vpop.f32.mrb[91].mxu0  ;;  %v1370_v61 = vpop.f32.mrb[101].mxu1 }
 0x306   :  { %v1143_v8 = vadd.f32 %v1142_v30, %v2835_v48 }
 0x307   :  { %1469 = vst [vmem:[%s3232_s7 + $0x2b8] sm:$0xff] %v1141_v49  ;;  %1471 = vst [vmem:[%s3232_s7 + $0x2c8] sm:$0xff] %v1369_v2 }
 0x308   :  { %1470 = vst [vmem:[%s3232_s7 + $0x2c0] sm:$0xff] %v1143_v8  ;;  %v1146_v17 = vpop.f32.mrb[92].mxu0  ;;  %v1373_v45 = vpop.f32.mrb[102].mxu1 }
 0x309   :  { %v1147_v21 = vadd.f32 %v1146_v17, %v2830_v47  ;;  %v1374_v0 = vadd.f32 %v1373_v45, %v2920_v37  ;;  %v1148_v15 = vpop.f32.mrb[93].mxu0  ;;  %v1375_v27 = vpop.f32.mrb[103].mxu1 }
 0x30a   :  { %v1149_v50 = vadd.f32 %v1148_v15, %v2835_v48 }
 0x30b   :  { %1472 = vst [vmem:[%s3232_s7 + $0x2d0] sm:$0xff] %v1147_v21  ;;  %1474 = vst [vmem:[%s3232_s7 + $0x2e0] sm:$0xff] %v1374_v0 }
 0x30c   :  { %1473 = vst [vmem:[%s3232_s7 + $0x2d8] sm:$0xff] %v1149_v50  ;;  %v1152_v51 = vpop.f32.mrb[94].mxu0  ;;  %v1378_v56 = vpop.f32.mrb[104].mxu1 }
 0x30d   :  { %v1153_v57 = vadd.f32 %v1152_v51, %v2830_v47  ;;  %v1379_v46 = vadd.f32 %v1378_v56, %v2920_v37  ;;  %v1154_v1 = vpop.f32.mrb[95].mxu0  ;;  %v1380_v62 = vpop.f32.mrb[105].mxu1 }
 0x30e   :  { %v1155_v63 = vadd.f32 %v1154_v1, %v2835_v48 }
 0x30f   :  { %1475 = vst [vmem:[%s3232_s7 + $0x2e8] sm:$0xff] %v1153_v57  ;;  %1477 = vst [vmem:[%s3232_s7 + $0x2f8] sm:$0xff] %v1379_v46 }
 0x310   :  { %1476 = vst [vmem:[%s3232_s7 + $0x2f0] sm:$0xff] %v1155_v63  ;;  %v1223_v3 = vpop.f32.mrb[96].mxu0 }
 0x311   :  { %v1224_v47 = vadd.f32 %v1223_v3, %v2920_v37  ;;  %v1225_v41 = vpop.f32.mrb[97].mxu0 }
 0x313   :  { %1384 = vst [vmem:[%s3232_s7 + $0x10] sm:$0xff] %v1224_v47 }
 0x314   :  { %v1228_v48 = vpop.f32.mrb[98].mxu0 }
 0x315   :  { %v1229_v5 = vadd.f32 %v1228_v48, %v2920_v37  ;;  %v1230_v9 = vpop.f32.mrb[99].mxu0 }
 0x317   :  { %1387 = vst [vmem:[%s3232_s7 + $0x28] sm:$0xff] %v1229_v5 }
 0x318   :  { %v1233_v12 = vpop.f32.mrb[100].mxu0 }
 0x319   :  { %v1234_v13 = vadd.f32 %v1233_v12, %v2920_v37  ;;  %v1235_v11 = vpop.f32.mrb[101].mxu0 }
 0x31b   :  { %1390 = vst [vmem:[%s3232_s7 + $0x40] sm:$0xff] %v1234_v13 }
 0x31c   :  { %v1238_v16 = vpop.f32.mrb[102].mxu0 }
 0x31d   :  { %v1239_v18 = vadd.f32 %v1238_v16, %v2920_v37  ;;  %v1240_v23 = vpop.f32.mrb[103].mxu0 }
 0x31f   :  { %1393 = vst [vmem:[%s3232_s7 + $0x58] sm:$0xff] %v1239_v18 }
 0x320   :  { %v1243_v24 = vpop.f32.mrb[104].mxu0 }
 0x321   :  { %v1244_v29 = vadd.f32 %v1243_v24, %v2920_v37  ;;  %v1245_v31 = vpop.f32.mrb[105].mxu0 }
 0x323   :  { %1396 = vst [vmem:[%s3232_s7 + $0x70] sm:$0xff] %v1244_v29 }
 0x324   :  { %v1248_v32 = vpop.f32.mrb[106].mxu0 }
 0x325   :  { %v1249_v33 = vadd.f32 %v1248_v32, %v2920_v37  ;;  %v1250_v20 = vpop.f32.mrb[107].mxu0 }
 0x327   :  { %1399 = vst [vmem:[%s3232_s7 + $0x88] sm:$0xff] %v1249_v33 }
 0x328   :  { %v1253_v39 = vpop.f32.mrb[108].mxu0 }
 0x329   :  { %v1254_v44 = vadd.f32 %v1253_v39, %v2920_v37  ;;  %v1255_v7 = vpop.f32.mrb[109].mxu0 }
 0x32b   :  { %1402 = vst [vmem:[%s3232_s7 + $0xa0] sm:$0xff] %v1254_v44 }
 0x32c   :  { %v1258_v19 = vpop.f32.mrb[110].mxu0 }
 0x32d   :  { %v1259_v22 = vadd.f32 %v1258_v19, %v2920_v37  ;;  %v1260_v55 = vpop.f32.mrb[111].mxu0 }
 0x32f   :  { %1405 = vst [vmem:[%s3232_s7 + $0xb8] sm:$0xff] %v1259_v22 }
 0x330   :  { %v1263_v58 = vpop.f32.mrb[112].mxu0 }
 0x331   :  { %v1264_v60 = vadd.f32 %v1263_v58, %v2920_v37  ;;  %v1265_v14 = vpop.f32.mrb[113].mxu0 }
 0x333   :  { %1408 = vst [vmem:[%s3232_s7 + $0xd0] sm:$0xff] %v1264_v60 }
 0x334   :  { %v1268_v10 = vpop.f32.mrb[114].mxu0 }
 0x335   :  { %v1269_v26 = vadd.f32 %v1268_v10, %v2920_v37  ;;  %v1270_v6 = vpop.f32.mrb[115].mxu0 }
 0x337   :  { %1411 = vst [vmem:[%s3232_s7 + $0xe8] sm:$0xff] %v1269_v26 }
 0x338   :  { %v1273_v54 = vpop.f32.mrb[116].mxu0 }
 0x339   :  { %v1274_v53 = vadd.f32 %v1273_v54, %v2920_v37  ;;  %v1275_v43 = vpop.f32.mrb[117].mxu0 }
 0x33b   :  { %1414 = vst [vmem:[%s3232_s7 + $0x100] sm:$0xff] %v1274_v53 }

</bundles_post_ra>
